<compile_context>
chip_gen: v7x
topology: tpu7x:2x2x1
jax: 0.10.0
libtpu: 0.0.40
codegen_flags: <defaults>
</compile_context>

<pallas_src>
import functools

import jax
import jax.numpy as jnp
from jax import lax
from jax.experimental import pallas as pl
from jax.experimental.pallas import tpu as pltpu


def _round_up(x, m):
    return (x + m - 1) // m * m


def lstm_decoder_kernel(xproj_ref, whh_ref, wfc_ref, bfc_ref, out_ref,
                        h_scr, c_scr, *, time_block, seq_len, hidden_pad):
    chunk = pl.program_id(0)
    H = hidden_pad

    # init hidden/cell state once, at the first time chunk
    @pl.when(chunk == 0)
    def _():
        h_scr[...] = jnp.zeros_like(h_scr)
        c_scr[...] = jnp.zeros_like(c_scr)

    # hoist the recurrent weight load out of the inner loop
    whh = whh_ref[...]                                   # (H_pad, 4*H_pad)

    def step(s, carry):
        h, c = carry
        # only the sequentially-dependent part stays in the loop:
        # one MXU dot per timestep, bias already folded into xproj
        gates = xproj_ref[s] + jnp.dot(h, whh,
                                       preferred_element_type=jnp.float32)
        # lane-aligned gate slabs (H_pad is a multiple of 128), PyTorch order
        i_g = jax.nn.sigmoid(gates[:, 0 * H:1 * H])
        f_g = jax.nn.sigmoid(gates[:, 1 * H:2 * H])
        g_g = jnp.tanh(gates[:, 2 * H:3 * H])
        o_g = jax.nn.sigmoid(gates[:, 3 * H:4 * H])
        c_new = f_g * c + i_g * g_g
        h_new = o_g * jnp.tanh(c_new)
        # mask padded tail timesteps (when seq_len % time_block != 0)
        valid = (chunk * time_block + s) < seq_len
        h = jnp.where(valid, h_new, h)
        c = jnp.where(valid, c_new, c)
        return h, c

    h, c = lax.fori_loop(0, time_block, step, (h_scr[...], c_scr[...]),
                         unroll=min(time_block, 8))
    h_scr[...] = h
    c_scr[...] = c

    # final linear layer on the last hidden state (lane-dense padded output)
    @pl.when(chunk == pl.num_programs(0) - 1)
    def _():
        out_ref[...] = (jnp.dot(h, wfc_ref[...],
                                preferred_element_type=jnp.float32)
                        + bfc_ref[...]).astype(out_ref.dtype)


def lstm_decoder(x, w_ih, w_hh, b_ih, b_hh, w_fc, b_fc, *, time_block=32):
    """x: (B, T, I) float32. Returns (B, output_size) float32."""
    B, T, I = x.shape
    H = w_hh.shape[1]
    O = w_fc.shape[0]

    f32 = jnp.float32
    B_pad = _round_up(B, 8)       # sublane alignment for f32
    H_pad = _round_up(H, 128)     # each gate occupies whole 128-lane slabs
    O_pad = _round_up(O, 128)     # lane-dense output store
    TB = min(time_block, T)       # timesteps per grid step
    T_pad = _round_up(T, TB)
    n_chunks = T_pad // TB

    # --- pad parameters gate-wise so PyTorch [i,f,g,o] order is preserved ---
    w_ih_p = jnp.zeros((4, H_pad, I), f32).at[:, :H, :].set(
        w_ih.astype(f32).reshape(4, H, I))
    w_hh_p = jnp.zeros((4, H_pad, H_pad), f32).at[:, :H, :H].set(
        w_hh.astype(f32).reshape(4, H, H))
    b_p = jnp.zeros((4, H_pad), f32).at[:, :H].set(
        (b_ih + b_hh).astype(f32).reshape(4, H))

    wih_t = w_ih_p.reshape(4 * H_pad, I).T               # (I, 4*H_pad)
    whh_t = w_hh_p.reshape(4 * H_pad, H_pad).T           # (H_pad, 4*H_pad)
    bias = b_p.reshape(1, 1, 4 * H_pad)                  # broadcast over (T,B)

    wfc_t = jnp.zeros((H_pad, O_pad), f32).at[:H, :O].set(w_fc.astype(f32).T)
    bfc = jnp.zeros((1, O_pad), f32).at[0, :O].set(b_fc.astype(f32))

    # --- hoisted input projection: one GEMM over all timesteps, bias folded;
    # the time-major output layout comes straight out of the GEMM, so there is
    # no separate transpose pass over x.
    x_p = jnp.zeros((B_pad, T, I), f32).at[:B].set(x.astype(f32))
    xproj = jnp.einsum('bti,ig->tbg', x_p, wih_t,
                       preferred_element_type=jnp.float32) + bias
    xproj = jnp.pad(xproj, ((0, T_pad - T), (0, 0), (0, 0)))  # (T_pad,B_pad,4H_pad)

    kernel = functools.partial(lstm_decoder_kernel, time_block=TB,
                               seq_len=T, hidden_pad=H_pad)

    grid_spec = pltpu.PrefetchScalarGridSpec(
        num_scalar_prefetch=0,
        grid=(n_chunks,),
        in_specs=[
            pl.BlockSpec((TB, B_pad, 4 * H_pad), lambda t: (t, 0, 0)),  # xproj
            pl.BlockSpec((H_pad, 4 * H_pad), lambda t: (0, 0)),         # W_hh^T
            pl.BlockSpec((H_pad, O_pad), lambda t: (0, 0)),             # W_fc^T
            pl.BlockSpec((1, O_pad), lambda t: (0, 0)),                 # b_fc
        ],
        out_specs=pl.BlockSpec((B_pad, O_pad), lambda t: (0, 0)),
        scratch_shapes=[
            pltpu.VMEM((B_pad, H_pad), jnp.float32),    # h
            pltpu.VMEM((B_pad, H_pad), jnp.float32),    # c
        ],
    )

    out = pl.pallas_call(
        kernel,
        out_shape=jax.ShapeDtypeStruct((B_pad, O_pad), jnp.float32),
        grid_spec=grid_spec,
        compiler_params=pltpu.CompilerParams(
            dimension_semantics=("arbitrary",)),   # time recurrence: sequential
    )(xproj, whh_t, wfc_t, bfc)

    # TODO(synk): on v7x (2 TCs) a leading "parallel" batch-block grid axis
    # would give ~2x for large batches; skipped here since B is tiny.
    return out[:B, :O]


def lstm_decoder_ref(x, w_ih, w_hh, b_ih, b_hh, w_fc, b_fc):
    """Pure-JAX reference mirroring torch.nn.LSTM (batch_first) semantics."""
    B, T, I = x.shape
    H = w_hh.shape[1]
    h = jnp.zeros((B, H), jnp.float32)
    c = jnp.zeros((B, H), jnp.float32)

    def step(carry, x_t):
        h, c = carry
        gates = x_t @ w_ih.T + h @ w_hh.T + b_ih + b_hh
        i_g = jax.nn.sigmoid(gates[:, 0 * H:1 * H])
        f_g = jax.nn.sigmoid(gates[:, 1 * H:2 * H])
        g_g = jnp.tanh(gates[:, 2 * H:3 * H])
        o_g = jax.nn.sigmoid(gates[:, 3 * H:4 * H])
        c = f_g * c + i_g * g_g
        h = o_g * jnp.tanh(c)
        return (h, c), None

    (h, c), _ = jax.lax.scan(step, (h, c), jnp.transpose(x, (1, 0, 2)))
    return h @ w_fc.T + b_fc


if __name__ == "__main__":
    # small shapes consistent with the module
    B, T = 2, 8
    input_size, hidden_size, output_size = 16, 32, 8

    key = jax.random.PRNGKey(0)
    ks = jax.random.split(key, 7)
    scale = 1.0 / jnp.sqrt(hidden_size)

    x = jax.random.normal(ks[0], (B, T, input_size), jnp.float32)
    w_ih = jax.random.uniform(ks[1], (4 * hidden_size, input_size),
                              jnp.float32, -scale, scale)
    w_hh = jax.random.uniform(ks[2], (4 * hidden_size, hidden_size),
                              jnp.float32, -scale, scale)
    b_ih = jax.random.uniform(ks[3], (4 * hidden_size,),
                              jnp.float32, -scale, scale)
    b_hh = jax.random.uniform(ks[4], (4 * hidden_size,),
                              jnp.float32, -scale, scale)
    w_fc = jax.random.uniform(ks[5], (output_size, hidden_size),
                              jnp.float32, -scale, scale)
    b_fc = jax.random.uniform(ks[6], (output_size,),
                              jnp.float32, -scale, scale)

    out = lstm_decoder(x, w_ih, w_hh, b_ih, b_hh, w_fc, b_fc)
    out = jax.block_until_ready(out)

    ref = lstm_decoder_ref(x, w_ih, w_hh, b_ih, b_hh, w_fc, b_fc)
    assert out.shape == (B, output_size)
    assert jnp.allclose(out, ref, atol=1e-5, rtol=1e-5), \
        f"max abs err {jnp.max(jnp.abs(out - ref))}"

    print("KERNEL_OK")
</pallas_src>

<mosaic_0001>
module attributes {stable_mosaic.version = 11 : i64} {
  func.func @lstm_decoder_kernel(%arg0: i32, %arg1: memref<8x8x512xf32, #tpu.memory_space<vmem>>, %arg2: memref<128x512xf32, #tpu.memory_space<vmem>>, %arg3: memref<128x128xf32, #tpu.memory_space<vmem>>, %arg4: memref<1x128xf32, #tpu.memory_space<vmem>>, %arg5: memref<8x128xf32, #tpu.memory_space<vmem>>, %arg6: memref<8x128xf32, #tpu.memory_space<vmem>>, %arg7: memref<8x128xf32, #tpu.memory_space<vmem>>) attributes {dimension_semantics = [#tpu.dimension_semantics<arbitrary>], iteration_bounds = array<i64: 1>, scalar_prefetch = 0 : i64, scratch_operands = 2 : i64, tpu.core_type = #tpu.core_type<tc>, window_params = [{transform_indices = @transform_0, window_bounds = array<i64: 8, 8, 512>}, {pipeline_mode = #tpu.pipeline_mode<synchronous>, transform_indices = @transform_1, window_bounds = array<i64: 128, 512>}, {pipeline_mode = #tpu.pipeline_mode<synchronous>, transform_indices = @transform_2, window_bounds = array<i64: 128, 128>}, {pipeline_mode = #tpu.pipeline_mode<synchronous>, transform_indices = @transform_3, window_bounds = array<i64: 1, 128>}, {pipeline_mode = #tpu.pipeline_mode<synchronous>, transform_indices = @transform_4, window_bounds = array<i64: 8, 128>}]} {
    %c0_i32 = arith.constant 0 : i32
    %0 = arith.cmpi eq, %arg0, %c0_i32 : i32
    %1 = arith.extui %0 : i1 to i32
    %c0_i32_0 = arith.constant 0 : i32
    %2 = arith.cmpi ne, %1, %c0_i32_0 : i32
    scf.if %2 {
      %cst_76 = arith.constant 0.000000e+00 : f32
      %291 = vector.broadcast %cst_76 : f32 to vector<8x128xf32>
      %c0_77 = arith.constant 0 : index
      %c0_78 = arith.constant 0 : index
      %292 = vector.load %arg6[%c0_77, %c0_78] : memref<8x128xf32, #tpu.memory_space<vmem>>, vector<8x128xf32>
      tpu.vector_store %arg6[%c0_77, %c0_78], %291 {strides = array<i32>} : memref<8x128xf32, #tpu.memory_space<vmem>>, vector<8x128xf32>,
      %cst_79 = arith.constant 0.000000e+00 : f32
      %293 = vector.broadcast %cst_79 : f32 to vector<8x128xf32>
      %c0_80 = arith.constant 0 : index
      %c0_81 = arith.constant 0 : index
      %294 = vector.load %arg7[%c0_80, %c0_81] : memref<8x128xf32, #tpu.memory_space<vmem>>, vector<8x128xf32>
      tpu.vector_store %arg7[%c0_80, %c0_81], %293 {strides = array<i32>} : memref<8x128xf32, #tpu.memory_space<vmem>>, vector<8x128xf32>,
    } else {
    }
    %c0 = arith.constant 0 : index
    %c0_1 = arith.constant 0 : index
    %3 = vector.load %arg2[%c0, %c0_1] : memref<128x512xf32, #tpu.memory_space<vmem>>, vector<128x512xf32>
    %c0_2 = arith.constant 0 : index
    %c0_3 = arith.constant 0 : index
    %4 = vector.load %arg6[%c0_2, %c0_3] : memref<8x128xf32, #tpu.memory_space<vmem>>, vector<8x128xf32>
    %c0_4 = arith.constant 0 : index
    %c0_5 = arith.constant 0 : index
    %5 = vector.load %arg7[%c0_4, %c0_5] : memref<8x128xf32, #tpu.memory_space<vmem>>, vector<8x128xf32>
    %c0_i32_6 = arith.constant 0 : i32
    %6 = arith.index_cast %c0_i32_6 : i32 to index
    %c0_7 = arith.constant 0 : index
    %c0_8 = arith.constant 0 : index
    %7 = vector.load %arg1[%6, %c0_7, %c0_8] : memref<8x8x512xf32, #tpu.memory_space<vmem>>, vector<1x8x512xf32>
    %8 = vector.shape_cast %7 : vector<1x8x512xf32> to vector<8x512xf32>
    %cst = arith.constant dense<0.000000e+00> : vector<8x512xf32>
    %9 = tpu.matmul %4, %3, %cst {dimension_numbers = #tpu.dot_dimension_numbers<[1], [0], [0], [1], [0, 0, 1, 1], [], []>} : vector<8x128xf32>, vector<128x512xf32>, vector<8x512xf32> -> vector<8x512xf32>
    %10 = arith.addf %8, %9 : vector<8x512xf32>
    %11 = vector.extract_strided_slice %10 {offsets = [0, 0], sizes = [8, 128], strides = [1, 1]} : vector<8x512xf32> to vector<8x128xf32>
    %12 = arith.negf %11 : vector<8x128xf32>
    %13 = math.exp %12 : vector<8x128xf32>
    %cst_9 = arith.constant 1.000000e+00 : f32
    %14 = vector.broadcast %cst_9 : f32 to vector<8x128xf32>
    %15 = arith.addf %14, %13 : vector<8x128xf32>
    %16 = arith.divf %14, %15 : vector<8x128xf32>
    %17 = vector.extract_strided_slice %10 {offsets = [0, 128], sizes = [8, 128], strides = [1, 1]} : vector<8x512xf32> to vector<8x128xf32>
    %18 = arith.negf %17 : vector<8x128xf32>
    %19 = math.exp %18 : vector<8x128xf32>
    %cst_10 = arith.constant 1.000000e+00 : f32
    %20 = vector.broadcast %cst_10 : f32 to vector<8x128xf32>
    %21 = arith.addf %20, %19 : vector<8x128xf32>
    %22 = arith.divf %20, %21 : vector<8x128xf32>
    %23 = vector.extract_strided_slice %10 {offsets = [0, 256], sizes = [8, 128], strides = [1, 1]} : vector<8x512xf32> to vector<8x128xf32>
    %24 = math.tanh %23 : vector<8x128xf32>
    %25 = vector.extract_strided_slice %10 {offsets = [0, 384], sizes = [8, 128], strides = [1, 1]} : vector<8x512xf32> to vector<8x128xf32>
    %26 = arith.negf %25 : vector<8x128xf32>
    %27 = math.exp %26 : vector<8x128xf32>
    %cst_11 = arith.constant 1.000000e+00 : f32
    %28 = vector.broadcast %cst_11 : f32 to vector<8x128xf32>
    %29 = arith.addf %28, %27 : vector<8x128xf32>
    %30 = arith.divf %28, %29 : vector<8x128xf32>
    %31 = arith.mulf %22, %5 : vector<8x128xf32>
    %32 = arith.mulf %16, %24 : vector<8x128xf32>
    %33 = arith.addf %31, %32 : vector<8x128xf32>
    %34 = math.tanh %33 : vector<8x128xf32>
    %35 = arith.mulf %30, %34 : vector<8x128xf32>
    %c8_i32 = arith.constant 8 : i32
    %36 = arith.muli %arg0, %c8_i32 : i32
    %37 = arith.addi %36, %c0_i32_6 : i32
    %c8_i32_12 = arith.constant 8 : i32
    %38 = arith.cmpi slt, %37, %c8_i32_12 : i32
    %39 = arith.select %38, %35, %4 : vector<8x128xf32>
    %40 = arith.select %38, %33, %5 : vector<8x128xf32>
    %c1_i32 = arith.constant 1 : i32
    %41 = arith.index_cast %c1_i32 : i32 to index
    %c0_13 = arith.constant 0 : index
    %c0_14 = arith.constant 0 : index
    %42 = vector.load %arg1[%41, %c0_13, %c0_14] : memref<8x8x512xf32, #tpu.memory_space<vmem>>, vector<1x8x512xf32>
    %43 = vector.shape_cast %42 : vector<1x8x512xf32> to vector<8x512xf32>
    %cst_15 = arith.constant dense<0.000000e+00> : vector<8x512xf32>
    %44 = tpu.matmul %39, %3, %cst_15 {dimension_numbers = #tpu.dot_dimension_numbers<[1], [0], [0], [1], [0, 0, 1, 1], [], []>} : vector<8x128xf32>, vector<128x512xf32>, vector<8x512xf32> -> vector<8x512xf32>
    %45 = arith.addf %43, %44 : vector<8x512xf32>
    %46 = vector.extract_strided_slice %45 {offsets = [0, 0], sizes = [8, 128], strides = [1, 1]} : vector<8x512xf32> to vector<8x128xf32>
    %47 = arith.negf %46 : vector<8x128xf32>
    %48 = math.exp %47 : vector<8x128xf32>
    %cst_16 = arith.constant 1.000000e+00 : f32
    %49 = vector.broadcast %cst_16 : f32 to vector<8x128xf32>
    %50 = arith.addf %49, %48 : vector<8x128xf32>
    %51 = arith.divf %49, %50 : vector<8x128xf32>
    %52 = vector.extract_strided_slice %45 {offsets = [0, 128], sizes = [8, 128], strides = [1, 1]} : vector<8x512xf32> to vector<8x128xf32>
    %53 = arith.negf %52 : vector<8x128xf32>
    %54 = math.exp %53 : vector<8x128xf32>
    %cst_17 = arith.constant 1.000000e+00 : f32
    %55 = vector.broadcast %cst_17 : f32 to vector<8x128xf32>
    %56 = arith.addf %55, %54 : vector<8x128xf32>
    %57 = arith.divf %55, %56 : vector<8x128xf32>
    %58 = vector.extract_strided_slice %45 {offsets = [0, 256], sizes = [8, 128], strides = [1, 1]} : vector<8x512xf32> to vector<8x128xf32>
    %59 = math.tanh %58 : vector<8x128xf32>
    %60 = vector.extract_strided_slice %45 {offsets = [0, 384], sizes = [8, 128], strides = [1, 1]} : vector<8x512xf32> to vector<8x128xf32>
    %61 = arith.negf %60 : vector<8x128xf32>
    %62 = math.exp %61 : vector<8x128xf32>
    %cst_18 = arith.constant 1.000000e+00 : f32
    %63 = vector.broadcast %cst_18 : f32 to vector<8x128xf32>
    %64 = arith.addf %63, %62 : vector<8x128xf32>
    %65 = arith.divf %63, %64 : vector<8x128xf32>
    %66 = arith.mulf %57, %40 : vector<8x128xf32>
    %67 = arith.mulf %51, %59 : vector<8x128xf32>
    %68 = arith.addf %66, %67 : vector<8x128xf32>
    %69 = math.tanh %68 : vector<8x128xf32>
    %70 = arith.mulf %65, %69 : vector<8x128xf32>
    %c8_i32_19 = arith.constant 8 : i32
    %71 = arith.muli %arg0, %c8_i32_19 : i32
    %72 = arith.addi %71, %c1_i32 : i32
    %c8_i32_20 = arith.constant 8 : i32
    %73 = arith.cmpi slt, %72, %c8_i32_20 : i32
    %74 = arith.select %73, %70, %39 : vector<8x128xf32>
    %75 = arith.select %73, %68, %40 : vector<8x128xf32>
    %c2_i32 = arith.constant 2 : i32
    %76 = arith.index_cast %c2_i32 : i32 to index
    %c0_21 = arith.constant 0 : index
    %c0_22 = arith.constant 0 : index
    %77 = vector.load %arg1[%76, %c0_21, %c0_22] : memref<8x8x512xf32, #tpu.memory_space<vmem>>, vector<1x8x512xf32>
    %78 = vector.shape_cast %77 : vector<1x8x512xf32> to vector<8x512xf32>
    %cst_23 = arith.constant dense<0.000000e+00> : vector<8x512xf32>
    %79 = tpu.matmul %74, %3, %cst_23 {dimension_numbers = #tpu.dot_dimension_numbers<[1], [0], [0], [1], [0, 0, 1, 1], [], []>} : vector<8x128xf32>, vector<128x512xf32>, vector<8x512xf32> -> vector<8x512xf32>
    %80 = arith.addf %78, %79 : vector<8x512xf32>
    %81 = vector.extract_strided_slice %80 {offsets = [0, 0], sizes = [8, 128], strides = [1, 1]} : vector<8x512xf32> to vector<8x128xf32>
    %82 = arith.negf %81 : vector<8x128xf32>
    %83 = math.exp %82 : vector<8x128xf32>
    %cst_24 = arith.constant 1.000000e+00 : f32
    %84 = vector.broadcast %cst_24 : f32 to vector<8x128xf32>
    %85 = arith.addf %84, %83 : vector<8x128xf32>
    %86 = arith.divf %84, %85 : vector<8x128xf32>
    %87 = vector.extract_strided_slice %80 {offsets = [0, 128], sizes = [8, 128], strides = [1, 1]} : vector<8x512xf32> to vector<8x128xf32>
    %88 = arith.negf %87 : vector<8x128xf32>
    %89 = math.exp %88 : vector<8x128xf32>
    %cst_25 = arith.constant 1.000000e+00 : f32
    %90 = vector.broadcast %cst_25 : f32 to vector<8x128xf32>
    %91 = arith.addf %90, %89 : vector<8x128xf32>
    %92 = arith.divf %90, %91 : vector<8x128xf32>
    %93 = vector.extract_strided_slice %80 {offsets = [0, 256], sizes = [8, 128], strides = [1, 1]} : vector<8x512xf32> to vector<8x128xf32>
    %94 = math.tanh %93 : vector<8x128xf32>
    %95 = vector.extract_strided_slice %80 {offsets = [0, 384], sizes = [8, 128], strides = [1, 1]} : vector<8x512xf32> to vector<8x128xf32>
    %96 = arith.negf %95 : vector<8x128xf32>
    %97 = math.exp %96 : vector<8x128xf32>
    %cst_26 = arith.constant 1.000000e+00 : f32
    %98 = vector.broadcast %cst_26 : f32 to vector<8x128xf32>
    %99 = arith.addf %98, %97 : vector<8x128xf32>
    %100 = arith.divf %98, %99 : vector<8x128xf32>
    %101 = arith.mulf %92, %75 : vector<8x128xf32>
    %102 = arith.mulf %86, %94 : vector<8x128xf32>
    %103 = arith.addf %101, %102 : vector<8x128xf32>
    %104 = math.tanh %103 : vector<8x128xf32>
    %105 = arith.mulf %100, %104 : vector<8x128xf32>
    %c8_i32_27 = arith.constant 8 : i32
    %106 = arith.muli %arg0, %c8_i32_27 : i32
    %107 = arith.addi %106, %c2_i32 : i32
    %c8_i32_28 = arith.constant 8 : i32
    %108 = arith.cmpi slt, %107, %c8_i32_28 : i32
    %109 = arith.select %108, %105, %74 : vector<8x128xf32>
    %110 = arith.select %108, %103, %75 : vector<8x128xf32>
    %c3_i32 = arith.constant 3 : i32
    %111 = arith.index_cast %c3_i32 : i32 to index
    %c0_29 = arith.constant 0 : index
    %c0_30 = arith.constant 0 : index
    %112 = vector.load %arg1[%111, %c0_29, %c0_30] : memref<8x8x512xf32, #tpu.memory_space<vmem>>, vector<1x8x512xf32>
    %113 = vector.shape_cast %112 : vector<1x8x512xf32> to vector<8x512xf32>
    %cst_31 = arith.constant dense<0.000000e+00> : vector<8x512xf32>
    %114 = tpu.matmul %109, %3, %cst_31 {dimension_numbers = #tpu.dot_dimension_numbers<[1], [0], [0], [1], [0, 0, 1, 1], [], []>} : vector<8x128xf32>, vector<128x512xf32>, vector<8x512xf32> -> vector<8x512xf32>
    %115 = arith.addf %113, %114 : vector<8x512xf32>
    %116 = vector.extract_strided_slice %115 {offsets = [0, 0], sizes = [8, 128], strides = [1, 1]} : vector<8x512xf32> to vector<8x128xf32>
    %117 = arith.negf %116 : vector<8x128xf32>
    %118 = math.exp %117 : vector<8x128xf32>
    %cst_32 = arith.constant 1.000000e+00 : f32
    %119 = vector.broadcast %cst_32 : f32 to vector<8x128xf32>
    %120 = arith.addf %119, %118 : vector<8x128xf32>
    %121 = arith.divf %119, %120 : vector<8x128xf32>
    %122 = vector.extract_strided_slice %115 {offsets = [0, 128], sizes = [8, 128], strides = [1, 1]} : vector<8x512xf32> to vector<8x128xf32>
    %123 = arith.negf %122 : vector<8x128xf32>
    %124 = math.exp %123 : vector<8x128xf32>
    %cst_33 = arith.constant 1.000000e+00 : f32
    %125 = vector.broadcast %cst_33 : f32 to vector<8x128xf32>
    %126 = arith.addf %125, %124 : vector<8x128xf32>
    %127 = arith.divf %125, %126 : vector<8x128xf32>
    %128 = vector.extract_strided_slice %115 {offsets = [0, 256], sizes = [8, 128], strides = [1, 1]} : vector<8x512xf32> to vector<8x128xf32>
    %129 = math.tanh %128 : vector<8x128xf32>
    %130 = vector.extract_strided_slice %115 {offsets = [0, 384], sizes = [8, 128], strides = [1, 1]} : vector<8x512xf32> to vector<8x128xf32>
    %131 = arith.negf %130 : vector<8x128xf32>
    %132 = math.exp %131 : vector<8x128xf32>
    %cst_34 = arith.constant 1.000000e+00 : f32
    %133 = vector.broadcast %cst_34 : f32 to vector<8x128xf32>
    %134 = arith.addf %133, %132 : vector<8x128xf32>
    %135 = arith.divf %133, %134 : vector<8x128xf32>
    %136 = arith.mulf %127, %110 : vector<8x128xf32>
    %137 = arith.mulf %121, %129 : vector<8x128xf32>
    %138 = arith.addf %136, %137 : vector<8x128xf32>
    %139 = math.tanh %138 : vector<8x128xf32>
    %140 = arith.mulf %135, %139 : vector<8x128xf32>
    %c8_i32_35 = arith.constant 8 : i32
    %141 = arith.muli %arg0, %c8_i32_35 : i32
    %142 = arith.addi %141, %c3_i32 : i32
    %c8_i32_36 = arith.constant 8 : i32
    %143 = arith.cmpi slt, %142, %c8_i32_36 : i32
    %144 = arith.select %143, %140, %109 : vector<8x128xf32>
    %145 = arith.select %143, %138, %110 : vector<8x128xf32>
    %c4_i32 = arith.constant 4 : i32
    %146 = arith.index_cast %c4_i32 : i32 to index
    %c0_37 = arith.constant 0 : index
    %c0_38 = arith.constant 0 : index
    %147 = vector.load %arg1[%146, %c0_37, %c0_38] : memref<8x8x512xf32, #tpu.memory_space<vmem>>, vector<1x8x512xf32>
    %148 = vector.shape_cast %147 : vector<1x8x512xf32> to vector<8x512xf32>
    %cst_39 = arith.constant dense<0.000000e+00> : vector<8x512xf32>
    %149 = tpu.matmul %144, %3, %cst_39 {dimension_numbers = #tpu.dot_dimension_numbers<[1], [0], [0], [1], [0, 0, 1, 1], [], []>} : vector<8x128xf32>, vector<128x512xf32>, vector<8x512xf32> -> vector<8x512xf32>
    %150 = arith.addf %148, %149 : vector<8x512xf32>
    %151 = vector.extract_strided_slice %150 {offsets = [0, 0], sizes = [8, 128], strides = [1, 1]} : vector<8x512xf32> to vector<8x128xf32>
    %152 = arith.negf %151 : vector<8x128xf32>
    %153 = math.exp %152 : vector<8x128xf32>
    %cst_40 = arith.constant 1.000000e+00 : f32
    %154 = vector.broadcast %cst_40 : f32 to vector<8x128xf32>
    %155 = arith.addf %154, %153 : vector<8x128xf32>
    %156 = arith.divf %154, %155 : vector<8x128xf32>
    %157 = vector.extract_strided_slice %150 {offsets = [0, 128], sizes = [8, 128], strides = [1, 1]} : vector<8x512xf32> to vector<8x128xf32>
    %158 = arith.negf %157 : vector<8x128xf32>
    %159 = math.exp %158 : vector<8x128xf32>
    %cst_41 = arith.constant 1.000000e+00 : f32
    %160 = vector.broadcast %cst_41 : f32 to vector<8x128xf32>
    %161 = arith.addf %160, %159 : vector<8x128xf32>
    %162 = arith.divf %160, %161 : vector<8x128xf32>
    %163 = vector.extract_strided_slice %150 {offsets = [0, 256], sizes = [8, 128], strides = [1, 1]} : vector<8x512xf32> to vector<8x128xf32>
    %164 = math.tanh %163 : vector<8x128xf32>
    %165 = vector.extract_strided_slice %150 {offsets = [0, 384], sizes = [8, 128], strides = [1, 1]} : vector<8x512xf32> to vector<8x128xf32>
    %166 = arith.negf %165 : vector<8x128xf32>
    %167 = math.exp %166 : vector<8x128xf32>
    %cst_42 = arith.constant 1.000000e+00 : f32
    %168 = vector.broadcast %cst_42 : f32 to vector<8x128xf32>
    %169 = arith.addf %168, %167 : vector<8x128xf32>
    %170 = arith.divf %168, %169 : vector<8x128xf32>
    %171 = arith.mulf %162, %145 : vector<8x128xf32>
    %172 = arith.mulf %156, %164 : vector<8x128xf32>
    %173 = arith.addf %171, %172 : vector<8x128xf32>
    %174 = math.tanh %173 : vector<8x128xf32>
    %175 = arith.mulf %170, %174 : vector<8x128xf32>
    %c8_i32_43 = arith.constant 8 : i32
    %176 = arith.muli %arg0, %c8_i32_43 : i32
    %177 = arith.addi %176, %c4_i32 : i32
    %c8_i32_44 = arith.constant 8 : i32
    %178 = arith.cmpi slt, %177, %c8_i32_44 : i32
    %179 = arith.select %178, %175, %144 : vector<8x128xf32>
    %180 = arith.select %178, %173, %145 : vector<8x128xf32>
    %c5_i32 = arith.constant 5 : i32
    %181 = arith.index_cast %c5_i32 : i32 to index
    %c0_45 = arith.constant 0 : index
    %c0_46 = arith.constant 0 : index
    %182 = vector.load %arg1[%181, %c0_45, %c0_46] : memref<8x8x512xf32, #tpu.memory_space<vmem>>, vector<1x8x512xf32>
    %183 = vector.shape_cast %182 : vector<1x8x512xf32> to vector<8x512xf32>
    %cst_47 = arith.constant dense<0.000000e+00> : vector<8x512xf32>
    %184 = tpu.matmul %179, %3, %cst_47 {dimension_numbers = #tpu.dot_dimension_numbers<[1], [0], [0], [1], [0, 0, 1, 1], [], []>} : vector<8x128xf32>, vector<128x512xf32>, vector<8x512xf32> -> vector<8x512xf32>
    %185 = arith.addf %183, %184 : vector<8x512xf32>
    %186 = vector.extract_strided_slice %185 {offsets = [0, 0], sizes = [8, 128], strides = [1, 1]} : vector<8x512xf32> to vector<8x128xf32>
    %187 = arith.negf %186 : vector<8x128xf32>
    %188 = math.exp %187 : vector<8x128xf32>
    %cst_48 = arith.constant 1.000000e+00 : f32
    %189 = vector.broadcast %cst_48 : f32 to vector<8x128xf32>
    %190 = arith.addf %189, %188 : vector<8x128xf32>
    %191 = arith.divf %189, %190 : vector<8x128xf32>
    %192 = vector.extract_strided_slice %185 {offsets = [0, 128], sizes = [8, 128], strides = [1, 1]} : vector<8x512xf32> to vector<8x128xf32>
    %193 = arith.negf %192 : vector<8x128xf32>
    %194 = math.exp %193 : vector<8x128xf32>
    %cst_49 = arith.constant 1.000000e+00 : f32
    %195 = vector.broadcast %cst_49 : f32 to vector<8x128xf32>
    %196 = arith.addf %195, %194 : vector<8x128xf32>
    %197 = arith.divf %195, %196 : vector<8x128xf32>
    %198 = vector.extract_strided_slice %185 {offsets = [0, 256], sizes = [8, 128], strides = [1, 1]} : vector<8x512xf32> to vector<8x128xf32>
    %199 = math.tanh %198 : vector<8x128xf32>
    %200 = vector.extract_strided_slice %185 {offsets = [0, 384], sizes = [8, 128], strides = [1, 1]} : vector<8x512xf32> to vector<8x128xf32>
    %201 = arith.negf %200 : vector<8x128xf32>
    %202 = math.exp %201 : vector<8x128xf32>
    %cst_50 = arith.constant 1.000000e+00 : f32
    %203 = vector.broadcast %cst_50 : f32 to vector<8x128xf32>
    %204 = arith.addf %203, %202 : vector<8x128xf32>
    %205 = arith.divf %203, %204 : vector<8x128xf32>
    %206 = arith.mulf %197, %180 : vector<8x128xf32>
    %207 = arith.mulf %191, %199 : vector<8x128xf32>
    %208 = arith.addf %206, %207 : vector<8x128xf32>
    %209 = math.tanh %208 : vector<8x128xf32>
    %210 = arith.mulf %205, %209 : vector<8x128xf32>
    %c8_i32_51 = arith.constant 8 : i32
    %211 = arith.muli %arg0, %c8_i32_51 : i32
    %212 = arith.addi %211, %c5_i32 : i32
    %c8_i32_52 = arith.constant 8 : i32
    %213 = arith.cmpi slt, %212, %c8_i32_52 : i32
    %214 = arith.select %213, %210, %179 : vector<8x128xf32>
    %215 = arith.select %213, %208, %180 : vector<8x128xf32>
    %c6_i32 = arith.constant 6 : i32
    %216 = arith.index_cast %c6_i32 : i32 to index
    %c0_53 = arith.constant 0 : index
    %c0_54 = arith.constant 0 : index
    %217 = vector.load %arg1[%216, %c0_53, %c0_54] : memref<8x8x512xf32, #tpu.memory_space<vmem>>, vector<1x8x512xf32>
    %218 = vector.shape_cast %217 : vector<1x8x512xf32> to vector<8x512xf32>
    %cst_55 = arith.constant dense<0.000000e+00> : vector<8x512xf32>
    %219 = tpu.matmul %214, %3, %cst_55 {dimension_numbers = #tpu.dot_dimension_numbers<[1], [0], [0], [1], [0, 0, 1, 1], [], []>} : vector<8x128xf32>, vector<128x512xf32>, vector<8x512xf32> -> vector<8x512xf32>
    %220 = arith.addf %218, %219 : vector<8x512xf32>
    %221 = vector.extract_strided_slice %220 {offsets = [0, 0], sizes = [8, 128], strides = [1, 1]} : vector<8x512xf32> to vector<8x128xf32>
    %222 = arith.negf %221 : vector<8x128xf32>
    %223 = math.exp %222 : vector<8x128xf32>
    %cst_56 = arith.constant 1.000000e+00 : f32
    %224 = vector.broadcast %cst_56 : f32 to vector<8x128xf32>
    %225 = arith.addf %224, %223 : vector<8x128xf32>
    %226 = arith.divf %224, %225 : vector<8x128xf32>
    %227 = vector.extract_strided_slice %220 {offsets = [0, 128], sizes = [8, 128], strides = [1, 1]} : vector<8x512xf32> to vector<8x128xf32>
    %228 = arith.negf %227 : vector<8x128xf32>
    %229 = math.exp %228 : vector<8x128xf32>
    %cst_57 = arith.constant 1.000000e+00 : f32
    %230 = vector.broadcast %cst_57 : f32 to vector<8x128xf32>
    %231 = arith.addf %230, %229 : vector<8x128xf32>
    %232 = arith.divf %230, %231 : vector<8x128xf32>
    %233 = vector.extract_strided_slice %220 {offsets = [0, 256], sizes = [8, 128], strides = [1, 1]} : vector<8x512xf32> to vector<8x128xf32>
    %234 = math.tanh %233 : vector<8x128xf32>
    %235 = vector.extract_strided_slice %220 {offsets = [0, 384], sizes = [8, 128], strides = [1, 1]} : vector<8x512xf32> to vector<8x128xf32>
    %236 = arith.negf %235 : vector<8x128xf32>
    %237 = math.exp %236 : vector<8x128xf32>
    %cst_58 = arith.constant 1.000000e+00 : f32
    %238 = vector.broadcast %cst_58 : f32 to vector<8x128xf32>
    %239 = arith.addf %238, %237 : vector<8x128xf32>
    %240 = arith.divf %238, %239 : vector<8x128xf32>
    %241 = arith.mulf %232, %215 : vector<8x128xf32>
    %242 = arith.mulf %226, %234 : vector<8x128xf32>
    %243 = arith.addf %241, %242 : vector<8x128xf32>
    %244 = math.tanh %243 : vector<8x128xf32>
    %245 = arith.mulf %240, %244 : vector<8x128xf32>
    %c8_i32_59 = arith.constant 8 : i32
    %246 = arith.muli %arg0, %c8_i32_59 : i32
    %247 = arith.addi %246, %c6_i32 : i32
    %c8_i32_60 = arith.constant 8 : i32
    %248 = arith.cmpi slt, %247, %c8_i32_60 : i32
    %249 = arith.select %248, %245, %214 : vector<8x128xf32>
    %250 = arith.select %248, %243, %215 : vector<8x128xf32>
    %c7_i32 = arith.constant 7 : i32
    %251 = arith.index_cast %c7_i32 : i32 to index
    %c0_61 = arith.constant 0 : index
    %c0_62 = arith.constant 0 : index
    %252 = vector.load %arg1[%251, %c0_61, %c0_62] : memref<8x8x512xf32, #tpu.memory_space<vmem>>, vector<1x8x512xf32>
    %253 = vector.shape_cast %252 : vector<1x8x512xf32> to vector<8x512xf32>
    %cst_63 = arith.constant dense<0.000000e+00> : vector<8x512xf32>
    %254 = tpu.matmul %249, %3, %cst_63 {dimension_numbers = #tpu.dot_dimension_numbers<[1], [0], [0], [1], [0, 0, 1, 1], [], []>} : vector<8x128xf32>, vector<128x512xf32>, vector<8x512xf32> -> vector<8x512xf32>
    %255 = arith.addf %253, %254 : vector<8x512xf32>
    %256 = vector.extract_strided_slice %255 {offsets = [0, 0], sizes = [8, 128], strides = [1, 1]} : vector<8x512xf32> to vector<8x128xf32>
    %257 = arith.negf %256 : vector<8x128xf32>
    %258 = math.exp %257 : vector<8x128xf32>
    %cst_64 = arith.constant 1.000000e+00 : f32
    %259 = vector.broadcast %cst_64 : f32 to vector<8x128xf32>
    %260 = arith.addf %259, %258 : vector<8x128xf32>
    %261 = arith.divf %259, %260 : vector<8x128xf32>
    %262 = vector.extract_strided_slice %255 {offsets = [0, 128], sizes = [8, 128], strides = [1, 1]} : vector<8x512xf32> to vector<8x128xf32>
    %263 = arith.negf %262 : vector<8x128xf32>
    %264 = math.exp %263 : vector<8x128xf32>
    %cst_65 = arith.constant 1.000000e+00 : f32
    %265 = vector.broadcast %cst_65 : f32 to vector<8x128xf32>
    %266 = arith.addf %265, %264 : vector<8x128xf32>
    %267 = arith.divf %265, %266 : vector<8x128xf32>
    %268 = vector.extract_strided_slice %255 {offsets = [0, 256], sizes = [8, 128], strides = [1, 1]} : vector<8x512xf32> to vector<8x128xf32>
    %269 = math.tanh %268 : vector<8x128xf32>
    %270 = vector.extract_strided_slice %255 {offsets = [0, 384], sizes = [8, 128], strides = [1, 1]} : vector<8x512xf32> to vector<8x128xf32>
    %271 = arith.negf %270 : vector<8x128xf32>
    %272 = math.exp %271 : vector<8x128xf32>
    %cst_66 = arith.constant 1.000000e+00 : f32
    %273 = vector.broadcast %cst_66 : f32 to vector<8x128xf32>
    %274 = arith.addf %273, %272 : vector<8x128xf32>
    %275 = arith.divf %273, %274 : vector<8x128xf32>
    %276 = arith.mulf %267, %250 : vector<8x128xf32>
    %277 = arith.mulf %261, %269 : vector<8x128xf32>
    %278 = arith.addf %276, %277 : vector<8x128xf32>
    %279 = math.tanh %278 : vector<8x128xf32>
    %280 = arith.mulf %275, %279 : vector<8x128xf32>
    %c8_i32_67 = arith.constant 8 : i32
    %281 = arith.muli %arg0, %c8_i32_67 : i32
    %282 = arith.addi %281, %c7_i32 : i32
    %c8_i32_68 = arith.constant 8 : i32
    %283 = arith.cmpi slt, %282, %c8_i32_68 : i32
    %284 = arith.select %283, %280, %249 : vector<8x128xf32>
    %285 = arith.select %283, %278, %250 : vector<8x128xf32>
    %c8_i32_69 = arith.constant 8 : i32
    %c0_70 = arith.constant 0 : index
    %c0_71 = arith.constant 0 : index
    %286 = vector.load %arg6[%c0_70, %c0_71] : memref<8x128xf32, #tpu.memory_space<vmem>>, vector<8x128xf32>
    tpu.vector_store %arg6[%c0_70, %c0_71], %284 {strides = array<i32>} : memref<8x128xf32, #tpu.memory_space<vmem>>, vector<8x128xf32>,
    %c0_72 = arith.constant 0 : index
    %c0_73 = arith.constant 0 : index
    %287 = vector.load %arg7[%c0_72, %c0_73] : memref<8x128xf32, #tpu.memory_space<vmem>>, vector<8x128xf32>
    tpu.vector_store %arg7[%c0_72, %c0_73], %285 {strides = array<i32>} : memref<8x128xf32, #tpu.memory_space<vmem>>, vector<8x128xf32>,
    %c0_i32_74 = arith.constant 0 : i32
    %288 = arith.cmpi eq, %arg0, %c0_i32_74 : i32
    %289 = arith.extui %288 : i1 to i32
    %c0_i32_75 = arith.constant 0 : i32
    %290 = arith.cmpi ne, %289, %c0_i32_75 : i32
    scf.if %290 {
      %c0_76 = arith.constant 0 : index
      %c0_77 = arith.constant 0 : index
      %291 = vector.load %arg3[%c0_76, %c0_77] : memref<128x128xf32, #tpu.memory_space<vmem>>, vector<128x128xf32>
      %cst_78 = arith.constant dense<0.000000e+00> : vector<8x128xf32>
      %292 = tpu.matmul %284, %291, %cst_78 {dimension_numbers = #tpu.dot_dimension_numbers<[1], [0], [0], [1], [0, 0, 1, 1], [], []>} : vector<8x128xf32>, vector<128x128xf32>, vector<8x128xf32> -> vector<8x128xf32>
      %c0_79 = arith.constant 0 : index
      %c0_80 = arith.constant 0 : index
      %293 = vector.load %arg4[%c0_79, %c0_80] : memref<1x128xf32, #tpu.memory_space<vmem>>, vector<1x128xf32>
      %294 = vector.broadcast %293 : vector<1x128xf32> to vector<8x128xf32>
      %295 = arith.addf %292, %294 : vector<8x128xf32>
      %c0_81 = arith.constant 0 : index
      %c0_82 = arith.constant 0 : index
      %296 = vector.load %arg5[%c0_81, %c0_82] : memref<8x128xf32, #tpu.memory_space<vmem>>, vector<8x128xf32>
      tpu.vector_store %arg5[%c0_81, %c0_82], %295 {strides = array<i32>} : memref<8x128xf32, #tpu.memory_space<vmem>>, vector<8x128xf32>,
    } else {
    }
    return
  }
  func.func @transform_0(%arg0: i32) -> (i32, i32, i32) {
    %c0_i32 = arith.constant 0 : i32
    %c0_i32_0 = arith.constant 0 : i32
    %c0_i32_1 = arith.constant 0 : i32
    return %arg0, %c0_i32, %c0_i32_0 : i32, i32, i32
  }
  func.func @transform_1(%arg0: i32) -> (i32, i32) {
    %c0_i32 = arith.constant 0 : i32
    %c0_i32_0 = arith.constant 0 : i32
    %c0_i32_1 = arith.constant 0 : i32
    return %c0_i32, %c0_i32_0 : i32, i32
  }
  func.func @transform_2(%arg0: i32) -> (i32, i32) {
    %c0_i32 = arith.constant 0 : i32
    %c0_i32_0 = arith.constant 0 : i32
    %c0_i32_1 = arith.constant 0 : i32
    return %c0_i32, %c0_i32_0 : i32, i32
  }
  func.func @transform_3(%arg0: i32) -> (i32, i32) {
    %c0_i32 = arith.constant 0 : i32
    %c0_i32_0 = arith.constant 0 : i32
    %c0_i32_1 = arith.constant 0 : i32
    return %c0_i32, %c0_i32_0 : i32, i32
  }
  func.func @transform_4(%arg0: i32) -> (i32, i32) {
    %c0_i32 = arith.constant 0 : i32
    %c0_i32_0 = arith.constant 0 : i32
    %c0_i32_1 = arith.constant 0 : i32
    return %c0_i32, %c0_i32_0 : i32, i32
  }
}

</mosaic_0001>

<bundles_post_ra>
// kernel: tpu_custom_call.1
= control target key start
LH: loop header
LB: loop body
LE: loop exit
PB: predicated region body
PF: predicated region fallthrough
CT: control target
= control target key end

     0   :  { %9 = vsyncpa [#allocation5], 0  ;;  %s3008_s0 = inlined_call_operand.hbm [shape: f32[8,8,512], index: 0, kind: input, shape index: {}]   ;;  %s3009_s1 = inlined_call_operand.hbm [shape: f32[128,512], index: 1, kind: input, shape index: {}]   ;;  %s3010_s2 = inlined_call_operand.hbm [shape: f32[128,128], index: 2, kind: input, shape index: {}]   ;;  %s3011_s3 = inlined_call_operand.vmem [shape: f32[1,128], index: 3, kind: input, shape index: {}]   ;;  %s3012_s4 = inlined_call_operand.hbm [shape: f32[8,128], index: 4, kind: output, shape index: {}]  }
   0x1   :  { %10 = vsyncpa [#allocation8], 0 }
   0x2   :  { %11 = vsyncpa [#allocation6], 0  ;;  %s2547_s15 = smov [#allocation7]   ;;  %s2548_s17 = smov [#allocation4]  }
   0x3   :  { %s29_s16 = sshll.u32 %s2547_s15, 4  ;;  %s17_s18 = sshll.u32 %s2548_s17, 4  ;;  %s30_s16 = int_to_ptr.vmem [resolvable:$true] %s29_s16  ;;  %s2583_s18 = int_to_ptr.vmem [resolvable:$true] %s17_s18 }
   0x4   :  { %s2453_s21 = scalar_lea.hbm %s3009_s1, 8192 }
   0x5   :  { %p2454_p0 = scmp.ne.s32.totalorder %s3009_s1, %s2453_s21  ;;  %p2457_p1 = scmp.lt.u32.totalorder %s2453_s21, %s3009_s1 }
   0x7   :  { %p2459_p2 = pnand %p2457_p1, %p2454_p0 }
   0x9   :  { %2462 = shalt.err (!%p2459_p2)
}
   0xa   :  { %s2463_s26 = scalar_lea.vmem %s30_s16, 8192  ;;  %p2468_p4 = scmp.lt.s32.totalorder %s30_s16, %s30_s16 }
   0xb   :  { %p2464_p3 = scmp.ne.s32.totalorder %s30_s16, %s2463_s26  ;;  %p2469_p5 = scmp.lt.s32.totalorder %s2463_s26, %s2463_s26 }
   0xd   :  { %p2470_p6 = por %p2469_p5, %p2468_p4 }
   0xf   :  { %p2471_p7 = pnand %p2470_p6, %p2464_p3 }
  0x11   :  { %2474 = shalt.err (!%p2471_p7)
}
  0x12   :  { %s2549_s27 = smov 512   ;;  %s2550_s28 = smov 32  }
  0x13   :  { %35 = dma.hbm_to_vmem [thread:$0]  %s3009_s1, 8192, %s30_s16, [#allocation8], %s2549_s27, %s2549_s27, %s2550_s28  }
  0x14   :  { %s2475_s7 = scalar_lea.hbm %s3008_s0, 4096 }
  0x15   :  { %p2476_p8 = scmp.ne.s32.totalorder %s3008_s0, %s2475_s7  ;;  %p2479_p9 = scmp.lt.u32.totalorder %s2475_s7, %s3008_s0 }
  0x17   :  { %p2481_p10 = pnand %p2479_p9, %p2476_p8 }
  0x19   :  { %2484 = shalt.err (!%p2481_p10)
}
  0x1a   :  { %s2485_s12 = scalar_lea.vmem %s2583_s18, 4096  ;;  %p2490_p12 = scmp.lt.s32.totalorder %s2583_s18, %s2583_s18 }
  0x1b   :  { %p2486_p11 = scmp.ne.s32.totalorder %s2583_s18, %s2485_s12  ;;  %p2491_p13 = scmp.lt.s32.totalorder %s2485_s12, %s2485_s12 }
  0x1d   :  { %p2492_p0 = por %p2491_p13, %p2490_p12 }
  0x1f   :  { %p2493_p1 = pnand %p2492_p0, %p2486_p11 }
  0x21   :  { %2496 = shalt.err (!%p2493_p1)
}
  0x22   :  { %23 = dma.hbm_to_vmem [thread:$0]  %s3008_s0, 4096, %s2583_s18, [#allocation5], %s2549_s27, %s2549_s27, %s2550_s28  }
  0x23   :  { %s2551_s14 = smov [#allocation9]   ;;  %s2497_s19 = scalar_lea.hbm %s3010_s2, 2048 }
  0x24   :  { %s41_s15 = sshll.u32 %s2551_s14, 4  ;;  %p2498_p2 = scmp.ne.s32.totalorder %s3010_s2, %s2497_s19  ;;  %s42_s15 = int_to_ptr.vmem [resolvable:$true] %s41_s15 }
  0x25   :  { %p2501_p3 = scmp.lt.u32.totalorder %s2497_s19, %s3010_s2 }
  0x27   :  { %p2503_p4 = pnand %p2501_p3, %p2498_p2 }
  0x29   :  { %2506 = shalt.err (!%p2503_p4)
}
  0x2a   :  { %s2507_s24 = scalar_lea.vmem %s42_s15, 2048  ;;  %p2512_p6 = scmp.lt.s32.totalorder %s42_s15, %s42_s15 }
  0x2b   :  { %p2508_p5 = scmp.ne.s32.totalorder %s42_s15, %s2507_s24  ;;  %p2513_p7 = scmp.lt.s32.totalorder %s2507_s24, %s2507_s24 }
  0x2d   :  { %p2514_p8 = por %p2513_p7, %p2512_p6 }
  0x2f   :  { %p2515_p9 = pnand %p2514_p8, %p2508_p5 }
  0x31   :  { %2518 = shalt.err (!%p2515_p9)
}
  0x32   :  { %s2552_s0 = smov 128   ;;  %s2553_s18 = smov 8  }
  0x33   :  { %47 = dma.hbm_to_vmem [thread:$0]  %s3010_s2, 2048, %s42_s15, [#allocation8], %s2552_s0, %s2552_s0, %s2553_s18  }
  0x34   :  { %2541 = dma.done.wait [#allocation5], 4096  }
  0x35   :  { %2542 = vsyncadd [#allocation5], 4294963200 }
  0x36   :  { %2543 = dma.done.wait [#allocation8], 10240  }
  0x37   :  { %2544 = vsyncadd [#allocation8], 4294957056  ;;  %v2554_v0 = vmov 0.0   ;;  %v66_v1 = vld [vmem:[#allocation7 + $0x8] sm:$0xff]  ;;  %v65_v3 = vld [vmem:[#allocation7] sm:$0xff]  ;;  %vm2556_vm0 = vmmov 0  }
  0x38   :  { %199 = vmatprep.mubr.f32.mxu0 %v2554_v0  ;;  %270 = vmatprep.mubr.f32.mxu1 %v2554_v0  ;;  %v70_v2 = vld [vmem:[#allocation7 + $0x28] sm:$0xff]  ;;  %v69_v5 = vld [vmem:[#allocation7 + $0x20] sm:$0xff]  ;;  %v68_v19 = vld [vmem:[#allocation7 + $0x18] sm:$0xff]  ;;  %s2557_s28 = smov [#allocation10]  }
  0x39   :  { %v2628_v4 = vpack.c.bf16 %v70_v2, %v66_v1  ;;  %v74_v6 = vld [vmem:[#allocation7 + $0x48] sm:$0xff]  ;;  %v2630_v8 = vpack.c.bf16 %v69_v5, %v65_v3  ;;  %v73_v10 = vld [vmem:[#allocation7 + $0x40] sm:$0xff]  ;;  %v72_v20 = vld [vmem:[#allocation7 + $0x38] sm:$0xff]  ;;  %s1691_s29 = sshll.u32 %s2557_s28, 4  ;;  %s1692_s29 = int_to_ptr.vmem [resolvable:$true] %s1691_s29 }
  0x3a   :  { %v78_v7 = vld [vmem:[#allocation7 + $0x68] sm:$0xff]  ;;  %v77_v11 = vld [vmem:[#allocation7 + $0x60] sm:$0xff]  ;;  %v2641_v22 = vpack.c.bf16 %v72_v20, %v68_v19  ;;  %v67_v23 = vld [vmem:[#allocation7 + $0x10] sm:$0xff]  ;;  %s2519_s30 = scalar_lea.vmem %s1692_s29, 128  ;;  %p2524_p11 = scmp.lt.s32.totalorder %s1692_s29, %s1692_s29 }
  0x3b   :  { %v2632_v9 = vpack.c.bf16 %v78_v7, %v74_v6  ;;  %v82_v12 = vld [vmem:[#allocation7 + $0x88] sm:$0xff]  ;;  %1779 = vmatprep.subr.bf16.mxu0 %v2628_v4  ;;  %v2636_v14 = vpack.c.bf16 %v77_v11, %v73_v10  ;;  %v81_v15 = vld [vmem:[#allocation7 + $0x80] sm:$0xff]  ;;  %v71_v24 = vld [vmem:[#allocation7 + $0x30] sm:$0xff]  ;;  %p2520_p10 = scmp.ne.s32.totalorder %s1692_s29, %s2519_s30  ;;  %p2525_p12 = scmp.lt.s32.totalorder %s2519_s30, %s2519_s30 }
  0x3c   :  { %v86_v13 = vld [vmem:[#allocation7 + $0xa8] sm:$0xff]  ;;  %1781 = vmatpush1.bf16.msra.mxu0 %v2630_v8  ;;  %v85_v16 = vld [vmem:[#allocation7 + $0xa0] sm:$0xff]  ;;  %v2643_v25 = vpack.c.bf16 %v71_v24, %v67_v23  ;;  %1811 = vmatprep.subr.bf16.mxu1 %v2641_v22  ;;  %v76_v27 = vld [vmem:[#allocation7 + $0x58] sm:$0xff] }
  0x3d   :  { %1783 = vmatprep.subr.bf16.mxu0 %v2632_v9  ;;  %v2639_v17 = vpack.c.bf16 %v86_v13, %v82_v12  ;;  %v90_v18 = vld [vmem:[#allocation7 + $0xc8] sm:$0xff]  ;;  %v2646_v26 = vpack.c.bf16 %v85_v16, %v81_v15  ;;  %v80_v28 = vld [vmem:[#allocation7 + $0x78] sm:$0xff]  ;;  %v75_v29 = vld [vmem:[#allocation7 + $0x50] sm:$0xff]  ;;  %p2526_p13 = por %p2525_p12, %p2524_p11 }
  0x3e   :  { %v94_v21 = vld [vmem:[#allocation7 + $0xe8] sm:$0xff]  ;;  %v89_v31 = vld [vmem:[#allocation7 + $0xc0] sm:$0xff]  ;;  %1813 = vmatpush1.bf16.msra.mxu1 %v2643_v25  ;;  %v2653_v33 = vpack.c.bf16 %v80_v28, %v76_v27  ;;  %v79_v34 = vld [vmem:[#allocation7 + $0x70] sm:$0xff] }
  0x3f   :  { %v2650_v30 = vpack.c.bf16 %v94_v21, %v90_v18  ;;  %v93_v32 = vld [vmem:[#allocation7 + $0xe0] sm:$0xff]  ;;  %v98_v35 = vld [vmem:[#allocation7 + $0x108] sm:$0xff]  ;;  %v2655_v37 = vpack.c.bf16 %v79_v34, %v75_v29  ;;  %v84_v38 = vld [vmem:[#allocation7 + $0x98] sm:$0xff]  ;;  %p2527_p0 = pnand %p2526_p13, %p2520_p10 }
  0x40   :  { %1785 = vmatpush1.bf16.msra.mxu0 %v2636_v14  ;;  %v102_v36 = vld [vmem:[#allocation7 + $0x128] sm:$0xff]  ;;  %1815 = vmatprep.subr.bf16.mxu1 %v2653_v33  ;;  %v88_v39 = vld [vmem:[#allocation7 + $0xb8] sm:$0xff]  ;;  %v83_v40 = vld [vmem:[#allocation7 + $0x90] sm:$0xff]  ;;  %v2659_v42 = vpack.c.bf16 %v93_v32, %v89_v31 }
  0x41   :  { %1787 = vmatprep.subr.bf16.mxu0 %v2639_v17  ;;  %v87_v41 = vld [vmem:[#allocation7 + $0xb0] sm:$0xff]  ;;  %v97_v43 = vld [vmem:[#allocation7 + $0x100] sm:$0xff]  ;;  %v2661_v45 = vpack.c.bf16 %v88_v39, %v84_v38  ;;  %v2664_v46 = vpack.c.bf16 %v102_v36, %v98_v35  ;;  %v106_v47 = vld [vmem:[#allocation7 + $0x148] sm:$0xff] }
  0x42   :  { %v101_v44 = vld [vmem:[#allocation7 + $0x120] sm:$0xff]  ;;  %1817 = vmatpush1.bf16.msra.mxu1 %v2655_v37  ;;  %v2667_v48 = vpack.c.bf16 %v87_v41, %v83_v40  ;;  %v92_v49 = vld [vmem:[#allocation7 + $0xd8] sm:$0xff]  ;;  %v110_v51 = vld [vmem:[#allocation7 + $0x168] sm:$0xff] }
  0x43   :  { %v96_v50 = vld [vmem:[#allocation7 + $0xf8] sm:$0xff]  ;;  %1819 = vmatprep.subr.bf16.mxu1 %v2661_v45  ;;  %v91_v53 = vld [vmem:[#allocation7 + $0xd0] sm:$0xff]  ;;  %v2673_v55 = vpack.c.bf16 %v101_v44, %v97_v43  ;;  %v2676_v58 = vpack.c.bf16 %v110_v51, %v106_v47  ;;  %v105_v59 = vld [vmem:[#allocation7 + $0x140] sm:$0xff] }
  0x44   :  { %1789 = vmatpush1.bf16.msra.mxu0 %v2646_v26  ;;  %v2670_v52 = vpack.c.bf16 %v96_v50, %v92_v49  ;;  %v95_v54 = vld [vmem:[#allocation7 + $0xf0] sm:$0xff]  ;;  %v100_v56 = vld [vmem:[#allocation7 + $0x118] sm:$0xff]  ;;  %v109_v60 = vld [vmem:[#allocation7 + $0x160] sm:$0xff] }
  0x45   :  { %1791 = vmatprep.subr.bf16.mxu0 %v2650_v30  ;;  %v104_v57 = vld [vmem:[#allocation7 + $0x138] sm:$0xff]  ;;  %v114_v61 = vld [vmem:[#allocation7 + $0x188] sm:$0xff]  ;;  %v2679_v62 = vpack.c.bf16 %v95_v54, %v91_v53  ;;  %v99_v2 = vld [vmem:[#allocation7 + $0x110] sm:$0xff]  ;;  %v2685_v7 = vpack.c.bf16 %v109_v60, %v105_v59 }
  0x46   :  { %1821 = vmatpush1.bf16.msra.mxu1 %v2667_v48  ;;  %v118_v63 = vld [vmem:[#allocation7 + $0x1a8] sm:$0xff]  ;;  %v2682_v1 = vpack.c.bf16 %v104_v57, %v100_v56  ;;  %v103_v3 = vld [vmem:[#allocation7 + $0x130] sm:$0xff]  ;;  %v108_v5 = vld [vmem:[#allocation7 + $0x158] sm:$0xff] }
  0x47   :  { %1823 = vmatprep.subr.bf16.mxu1 %v2670_v52  ;;  %v112_v6 = vld [vmem:[#allocation7 + $0x178] sm:$0xff]  ;;  %v2688_v10 = vpack.c.bf16 %v118_v63, %v114_v61  ;;  %v113_v11 = vld [vmem:[#allocation7 + $0x180] sm:$0xff]  ;;  %v122_v13 = vld [vmem:[#allocation7 + $0x1c8] sm:$0xff]  ;;  %v2691_v15 = vpack.c.bf16 %v103_v3, %v99_v2 }
  0x48   :  { %1793 = vmatpush1.bf16.msra.mxu0 %v2659_v42  ;;  %v117_v12 = vld [vmem:[#allocation7 + $0x1a0] sm:$0xff]  ;;  %v126_v16 = vld [vmem:[#allocation7 + $0x1e8] sm:$0xff]  ;;  %v2694_v18 = vpack.c.bf16 %v112_v6, %v108_v5  ;;  %v107_v19 = vld [vmem:[#allocation7 + $0x150] sm:$0xff] }
  0x49   :  { %1795 = vmatprep.subr.bf16.mxu0 %v2664_v46  ;;  %v111_v20 = vld [vmem:[#allocation7 + $0x170] sm:$0xff]  ;;  %v116_v21 = vld [vmem:[#allocation7 + $0x198] sm:$0xff]  ;;  %v2697_v24 = vpack.c.bf16 %v117_v12, %v113_v11  ;;  %v2700_v27 = vpack.c.bf16 %v126_v16, %v122_v13  ;;  %v121_v28 = vld [vmem:[#allocation7 + $0x1c0] sm:$0xff] }
  0x4a   :  { %1825 = vmatpush1.bf16.msra.mxu1 %v2679_v62  ;;  %v120_v23 = vld [vmem:[#allocation7 + $0x1b8] sm:$0xff]  ;;  %v125_v29 = vld [vmem:[#allocation7 + $0x1e0] sm:$0xff]  ;;  %v2703_v31 = vpack.c.bf16 %v111_v20, %v107_v19  ;;  %v115_v34 = vld [vmem:[#allocation7 + $0x190] sm:$0xff] }
  0x4b   :  { %1827 = vmatprep.subr.bf16.mxu1 %v2682_v1  ;;  %v2706_v32 = vpack.c.bf16 %v120_v23, %v116_v21  ;;  %v119_v35 = vld [vmem:[#allocation7 + $0x1b0] sm:$0xff]  ;;  %v124_v36 = vld [vmem:[#allocation7 + $0x1d8] sm:$0xff]  ;;  %v2709_v39 = vpack.c.bf16 %v125_v29, %v121_v28  ;;  %v131_v49 = vld [vmem:[#allocation4] sm:$0xff] }
  0x4c   :  { %1797 = vmatpush1.bf16.msra.mxu0 %v2673_v55  ;;  %v128_v38 = vld [vmem:[#allocation7 + $0x1f8] sm:$0xff]  ;;  %v2713_v40 = vpack.c.bf16 %v119_v35, %v115_v34  ;;  %v123_v43 = vld [vmem:[#allocation7 + $0x1d0] sm:$0xff]  ;;  %v132_v50 = vld [vmem:[#allocation4 + $0x8] sm:$0xff] }
  0x4d   :  { %1799 = vmatprep.subr.bf16.mxu0 %v2676_v58  ;;  %v2716_v41 = vpack.c.bf16 %v128_v38, %v124_v36  ;;  %v127_v44 = vld [vmem:[#allocation7 + $0x1f0] sm:$0xff]  ;;  %v134_v60 = vld [vmem:[#allocation4 + $0x18] sm:$0xff] }
  0x4e   :  { %1829 = vmatpush1.bf16.msra.mxu1 %v2691_v15  ;;  %v2720_v47 = vpack.c.bf16 %v127_v44, %v123_v43  ;;  %v133_v3 = vld [vmem:[#allocation4 + $0x10] sm:$0xff]  ;;  %v313_v44 = vld [vmem:[#allocation4 + $0x20] sm:$0xff] }
  0x4f   :  { %1831 = vmatprep.subr.bf16.mxu1 %v2694_v18 }
  0x50   :  { %1801 = vmatpush1.bf16.msra.mxu0 %v2685_v7 }
  0x51   :  { %1803 = vmatprep.subr.bf16.mxu0 %v2688_v10 }
  0x52   :  { %1833 = vmatpush1.bf16.msra.mxu1 %v2703_v31 }
  0x53   :  { %1835 = vmatprep.subr.bf16.mxu1 %v2706_v32 }
  0x54   :  { %1805 = vmatpush1.bf16.msra.mxu0 %v2697_v24 }
  0x55   :  { %1807 = vmatprep.subr.bf16.mxu0 %v2700_v27 }
  0x56   :  { %1837 = vmatpush1.bf16.msra.mxu1 %v2713_v40 }
  0x57   :  { %1839 = vmatprep.subr.bf16.mxu1 %v2716_v41 }
  0x58   :  { %1809 = vmatpush1.bf16.msra.mxu0 %v2709_v39 }
  0x59   :  { %1843 = vmatprep.subr.bf16.mxu0 %v2628_v4 }
  0x5a   :  { %1841 = vmatpush1.bf16.msra.mxu1 %v2720_v47 }
  0x5b   :  { %200 = vmatmul.mubr.f32.vlgmr.msra.gmra.mrb[0].mxu0 %v2554_v0  ;;  %1875 = vmatprep.subr.bf16.mxu1 %v2641_v22 }
  0x5c   :  { %1845 = vmatpush1.bf16.msra.mxu0 %v2630_v8  ;;  %381 = vmatprep.mubr.f32.mxu0 %v2554_v0 }
  0x5d   :  { %1847 = vmatprep.subr.bf16.mxu0 %v2632_v9  ;;  %271 = vmatmul.mubr.f32.vlgmr.msra.gmra.mrb[0].mxu1 %v2554_v0 }
  0x5e   :  { %1877 = vmatpush1.bf16.msra.mxu1 %v2643_v25  ;;  %452 = vmatprep.mubr.f32.mxu1 %v2554_v0 }
  0x5f   :  { %1879 = vmatprep.subr.bf16.mxu1 %v2653_v33 }
  0x60   :  { %1849 = vmatpush1.bf16.msra.mxu0 %v2636_v14 }
  0x61   :  { %1851 = vmatprep.subr.bf16.mxu0 %v2639_v17 }
  0x62   :  { %1881 = vmatpush1.bf16.msra.mxu1 %v2655_v37 }
  0x63   :  { %1883 = vmatprep.subr.bf16.mxu1 %v2661_v45 }
  0x64   :  { %1853 = vmatpush1.bf16.msra.mxu0 %v2646_v26 }
  0x65   :  { %1855 = vmatprep.subr.bf16.mxu0 %v2650_v30 }
  0x66   :  { %1885 = vmatpush1.bf16.msra.mxu1 %v2667_v48 }
  0x67   :  { %1887 = vmatprep.subr.bf16.mxu1 %v2670_v52 }
  0x68   :  { %1857 = vmatpush1.bf16.msra.mxu0 %v2659_v42 }
  0x69   :  { %1859 = vmatprep.subr.bf16.mxu0 %v2664_v46 }
  0x6a   :  { %1889 = vmatpush1.bf16.msra.mxu1 %v2679_v62 }
  0x6b   :  { %1891 = vmatprep.subr.bf16.mxu1 %v2682_v1 }
  0x6c   :  { %1861 = vmatpush1.bf16.msra.mxu0 %v2673_v55 }
  0x6d   :  { %1863 = vmatprep.subr.bf16.mxu0 %v2676_v58 }
  0x6e   :  { %1893 = vmatpush1.bf16.msra.mxu1 %v2691_v15 }
  0x6f   :  { %1895 = vmatprep.subr.bf16.mxu1 %v2694_v18 }
  0x70   :  { %1865 = vmatpush1.bf16.msra.mxu0 %v2685_v7 }
  0x71   :  { %1867 = vmatprep.subr.bf16.mxu0 %v2688_v10 }
  0x72   :  { %1897 = vmatpush1.bf16.msra.mxu1 %v2703_v31 }
  0x73   :  { %1899 = vmatprep.subr.bf16.mxu1 %v2706_v32 }
  0x74   :  { %1869 = vmatpush1.bf16.msra.mxu0 %v2697_v24 }
  0x75   :  { %1871 = vmatprep.subr.bf16.mxu0 %v2700_v27 }
  0x76   :  { %1901 = vmatpush1.bf16.msra.mxu1 %v2713_v40 }
  0x77   :  { %1903 = vmatprep.subr.bf16.mxu1 %v2716_v41 }
  0x78   :  { %1873 = vmatpush1.bf16.msra.mxu0 %v2709_v39 }
  0x79   :  { %1907 = vmatprep.subr.bf16.mxu0 %v2628_v4 }
  0x7a   :  { %1905 = vmatpush1.bf16.msra.mxu1 %v2720_v47 }
  0x7b   :  { %1939 = vmatprep.subr.bf16.mxu1 %v2641_v22 }
 0x12e   :  { %v201_v51 = vpop.f32.mrb[0].mxu0 }
 0x12f   :  { %v277_v53 = vadd.f32 %v201_v51, %v131_v49  ;;  %v203_v54 = vpop.f32.mrb[1].mxu0  ;;  %v314_v49 = vld [vmem:[#allocation4 + $0x28] sm:$0xff] }
 0x130   :  { %v278_v56 = vadd.f32 %v203_v54, %v132_v50  ;;  %v272_v61 = vpop.f32.mrb[0].mxu1 }
 0x131   :  { %v1701_v57 = vmul.f32 -1.442695, %v277_v53  ;;  %v274_v63 = vpop.f32.mrb[1].mxu1  ;;  %v279_v6 = vadd.f32 %v272_v61, %v133_v3  ;;  %v316_v61 = vld [vmem:[#allocation4 + $0x38] sm:$0xff] }
 0x132   :  { %v1702_v59 = vmul.f32 -1.442695, %v278_v56  ;;  %v280_v2 = vadd.f32 %v274_v63, %v134_v60 }
 0x133   :  { %2325 = vpow2.f32 %v1701_v57 }
 0x134   :  { %2327 = vpow2.f32 %v1702_v59  ;;  %v1703_v5 = vmul.f32 -1.442695, %v280_v2  ;;  %v315_v2 = vld [vmem:[#allocation4 + $0x30] sm:$0xff] }
 0x136   :  { %2329 = vpow2.f32 %v1703_v5 }
 0x137   :  { %2331 = vtanh.f32 %v279_v6 }
 0x13d   :  { %v2326_v11 = vpop.eup %2325 }
 0x13e   :  { %v2328_v12 = vpop.eup %2327  ;;  %v284_v13 = vadd.f32 1.0, %v2326_v11 }
 0x13f   :  { %v290_v16 = vadd.f32 1.0, %v2328_v12 }
 0x140   :  { %2333 = vrcp.f32 %v284_v13  ;;  %v2330_v19 = vpop.eup %2329 }
 0x141   :  { %2335 = vrcp.f32 %v290_v16  ;;  %v2332_v20 = vpop.eup %2331  ;;  %v297_v23 = vadd.f32 1.0, %v2330_v19 }
 0x143   :  { %2337 = vrcp.f32 %v297_v23 }
 0x14a   :  { %v2334_v21 = vpop.eup %2333 }
 0x14b   :  { %v2336_v28 = vpop.eup %2335  ;;  %v301_v29 = vmul.f32 %v2334_v21, %v2332_v20 }
 0x14c   :  { %v300_v34 = vmul.f32 0.0, %v2336_v28 }
 0x14d   :  { %v2338_v36 = vpop.eup %2337 }
 0x14e   :  { %v2762_v35 = vadd.f32 %v301_v29, %v300_v34 }
 0x150   :  { %2339 = vtanh.f32 %v2762_v35 }
 0x15a   :  { %v2340_v38 = vpop.eup %2339 }
 0x15b   :  { %v304_v43 = vmul.f32 %v2340_v38, %v2338_v36 }
 0x15d   :  { %382 = vmatmul.mubr.f32.vlgmr.msra.gmra.mrb[2].mxu0 %v304_v43  ;;  %453 = vmatmul.mubr.f32.vlgmr.msra.gmra.mrb[2].mxu1 %v304_v43 }
 0x15e   :  { %1909 = vmatpush1.bf16.msra.mxu0 %v2630_v8  ;;  %1941 = vmatpush1.bf16.msra.mxu1 %v2643_v25 }
 0x15f   :  { %1911 = vmatprep.subr.bf16.mxu0 %v2632_v9  ;;  %1943 = vmatprep.subr.bf16.mxu1 %v2653_v33 }
 0x160   :  { %563 = vmatprep.mubr.f32.mxu0 %v2554_v0  ;;  %634 = vmatprep.mubr.f32.mxu1 %v2554_v0 }
 0x162   :  { %1913 = vmatpush1.bf16.msra.mxu0 %v2636_v14  ;;  %1945 = vmatpush1.bf16.msra.mxu1 %v2655_v37 }
 0x163   :  { %1915 = vmatprep.subr.bf16.mxu0 %v2639_v17  ;;  %1947 = vmatprep.subr.bf16.mxu1 %v2661_v45 }
 0x166   :  { %1917 = vmatpush1.bf16.msra.mxu0 %v2646_v26  ;;  %1949 = vmatpush1.bf16.msra.mxu1 %v2667_v48 }
 0x167   :  { %1919 = vmatprep.subr.bf16.mxu0 %v2650_v30  ;;  %1951 = vmatprep.subr.bf16.mxu1 %v2670_v52 }
 0x16a   :  { %1921 = vmatpush1.bf16.msra.mxu0 %v2659_v42  ;;  %1953 = vmatpush1.bf16.msra.mxu1 %v2679_v62 }
 0x16b   :  { %1923 = vmatprep.subr.bf16.mxu0 %v2664_v46  ;;  %1955 = vmatprep.subr.bf16.mxu1 %v2682_v1 }
 0x16e   :  { %1925 = vmatpush1.bf16.msra.mxu0 %v2673_v55  ;;  %1957 = vmatpush1.bf16.msra.mxu1 %v2691_v15 }
 0x16f   :  { %1927 = vmatprep.subr.bf16.mxu0 %v2676_v58  ;;  %1959 = vmatprep.subr.bf16.mxu1 %v2694_v18 }
 0x172   :  { %1929 = vmatpush1.bf16.msra.mxu0 %v2685_v7  ;;  %1961 = vmatpush1.bf16.msra.mxu1 %v2703_v31 }
 0x173   :  { %1931 = vmatprep.subr.bf16.mxu0 %v2688_v10  ;;  %1963 = vmatprep.subr.bf16.mxu1 %v2706_v32 }
 0x176   :  { %1933 = vmatpush1.bf16.msra.mxu0 %v2697_v24  ;;  %1965 = vmatpush1.bf16.msra.mxu1 %v2713_v40 }
 0x177   :  { %1935 = vmatprep.subr.bf16.mxu0 %v2700_v27  ;;  %1967 = vmatprep.subr.bf16.mxu1 %v2716_v41 }
 0x17a   :  { %1937 = vmatpush1.bf16.msra.mxu0 %v2709_v39  ;;  %1969 = vmatpush1.bf16.msra.mxu1 %v2720_v47 }
 0x17b   :  { %1971 = vmatprep.subr.bf16.mxu0 %v2628_v4  ;;  %2003 = vmatprep.subr.bf16.mxu1 %v2641_v22 }
 0x230   :  { %v383_v50 = vpop.f32.mrb[2].mxu0  ;;  %v454_v51 = vpop.f32.mrb[2].mxu1 }
 0x231   :  { %v459_v53 = vadd.f32 %v383_v50, %v313_v44  ;;  %v385_v54 = vpop.f32.mrb[3].mxu0  ;;  %v456_v56 = vpop.f32.mrb[3].mxu1  ;;  %v461_v5 = vadd.f32 %v454_v51, %v315_v2  ;;  %v496_v44 = vld [vmem:[#allocation4 + $0x48] sm:$0xff] }
 0x232   :  { %v460_v57 = vadd.f32 %v385_v54, %v314_v49  ;;  %v462_v63 = vadd.f32 %v456_v56, %v316_v61 }
 0x233   :  { %v1704_v59 = vmul.f32 -1.442695, %v459_v53 }
 0x234   :  { %v1705_v60 = vmul.f32 -1.442695, %v460_v57  ;;  %v1706_v3 = vmul.f32 -1.442695, %v462_v63  ;;  %v497_v63 = vld [vmem:[#allocation4 + $0x50] sm:$0xff] }
 0x235   :  { %2341 = vpow2.f32 %v1704_v59 }
 0x236   :  { %2343 = vpow2.f32 %v1705_v60  ;;  %v498_v60 = vld [vmem:[#allocation4 + $0x58] sm:$0xff] }
 0x237   :  { %2345 = vpow2.f32 %v1706_v3 }
 0x238   :  { %2347 = vtanh.f32 %v461_v5 }
 0x23f   :  { %v2342_v6 = vpop.eup %2341 }
 0x240   :  { %v2344_v11 = vpop.eup %2343  ;;  %v466_v12 = vadd.f32 1.0, %v2342_v6 }
 0x241   :  { %v472_v13 = vadd.f32 1.0, %v2344_v11  ;;  %v2346_v16 = vpop.eup %2345 }
 0x242   :  { %2349 = vrcp.f32 %v466_v12  ;;  %v2348_v19 = vpop.eup %2347  ;;  %v479_v28 = vadd.f32 1.0, %v2346_v16 }
 0x243   :  { %2351 = vrcp.f32 %v472_v13 }
 0x244   :  { %2353 = vrcp.f32 %v479_v28 }
 0x24c   :  { %v2350_v20 = vpop.eup %2349 }
 0x24d   :  { %v2352_v21 = vpop.eup %2351  ;;  %v483_v23 = vmul.f32 %v2350_v20, %v2348_v19 }
 0x24e   :  { %v482_v29 = vmul.f32 %v2352_v21, %v2762_v35  ;;  %v2354_v36 = vpop.eup %2353  ;;  %v495_v35 = vld [vmem:[#allocation4 + $0x40] sm:$0xff] }
 0x250   :  { %v2800_v34 = vadd.f32 %v483_v23, %v482_v29 }
 0x252   :  { %2355 = vtanh.f32 %v2800_v34 }
 0x25c   :  { %v2356_v38 = vpop.eup %2355 }
 0x25d   :  { %v486_v43 = vmul.f32 %v2356_v38, %v2354_v36 }
 0x25f   :  { %564 = vmatmul.mubr.f32.vlgmr.msra.gmra.mrb[4].mxu0 %v486_v43  ;;  %635 = vmatmul.mubr.f32.vlgmr.msra.gmra.mrb[4].mxu1 %v486_v43 }
 0x260   :  { %1973 = vmatpush1.bf16.msra.mxu0 %v2630_v8  ;;  %2005 = vmatpush1.bf16.msra.mxu1 %v2643_v25 }
 0x261   :  { %1975 = vmatprep.subr.bf16.mxu0 %v2632_v9  ;;  %2007 = vmatprep.subr.bf16.mxu1 %v2653_v33 }
 0x262   :  { %745 = vmatprep.mubr.f32.mxu0 %v2554_v0  ;;  %816 = vmatprep.mubr.f32.mxu1 %v2554_v0 }
 0x264   :  { %1977 = vmatpush1.bf16.msra.mxu0 %v2636_v14  ;;  %2009 = vmatpush1.bf16.msra.mxu1 %v2655_v37 }
 0x265   :  { %1979 = vmatprep.subr.bf16.mxu0 %v2639_v17  ;;  %2011 = vmatprep.subr.bf16.mxu1 %v2661_v45 }
 0x268   :  { %1981 = vmatpush1.bf16.msra.mxu0 %v2646_v26  ;;  %2013 = vmatpush1.bf16.msra.mxu1 %v2667_v48 }
 0x269   :  { %1983 = vmatprep.subr.bf16.mxu0 %v2650_v30  ;;  %2015 = vmatprep.subr.bf16.mxu1 %v2670_v52 }
 0x26c   :  { %1985 = vmatpush1.bf16.msra.mxu0 %v2659_v42  ;;  %2017 = vmatpush1.bf16.msra.mxu1 %v2679_v62 }
 0x26d   :  { %1987 = vmatprep.subr.bf16.mxu0 %v2664_v46  ;;  %2019 = vmatprep.subr.bf16.mxu1 %v2682_v1 }
 0x270   :  { %1989 = vmatpush1.bf16.msra.mxu0 %v2673_v55  ;;  %2021 = vmatpush1.bf16.msra.mxu1 %v2691_v15 }
 0x271   :  { %1991 = vmatprep.subr.bf16.mxu0 %v2676_v58  ;;  %2023 = vmatprep.subr.bf16.mxu1 %v2694_v18 }
 0x274   :  { %1993 = vmatpush1.bf16.msra.mxu0 %v2685_v7  ;;  %2025 = vmatpush1.bf16.msra.mxu1 %v2703_v31 }
 0x275   :  { %1995 = vmatprep.subr.bf16.mxu0 %v2688_v10  ;;  %2027 = vmatprep.subr.bf16.mxu1 %v2706_v32 }
 0x278   :  { %1997 = vmatpush1.bf16.msra.mxu0 %v2697_v24  ;;  %2029 = vmatpush1.bf16.msra.mxu1 %v2713_v40 }
 0x279   :  { %1999 = vmatprep.subr.bf16.mxu0 %v2700_v27  ;;  %2031 = vmatprep.subr.bf16.mxu1 %v2716_v41 }
 0x27c   :  { %2001 = vmatpush1.bf16.msra.mxu0 %v2709_v39  ;;  %2033 = vmatpush1.bf16.msra.mxu1 %v2720_v47 }
 0x27d   :  { %2035 = vmatprep.subr.bf16.mxu0 %v2628_v4  ;;  %2067 = vmatprep.subr.bf16.mxu1 %v2641_v22 }
 0x332   :  { %v565_v49 = vpop.f32.mrb[4].mxu0  ;;  %v636_v50 = vpop.f32.mrb[4].mxu1 }
 0x333   :  { %v641_v51 = vadd.f32 %v565_v49, %v495_v35  ;;  %v567_v53 = vpop.f32.mrb[5].mxu0  ;;  %v638_v54 = vpop.f32.mrb[5].mxu1  ;;  %v643_v3 = vadd.f32 %v636_v50, %v497_v63  ;;  %v678_v35 = vld [vmem:[#allocation4 + $0x68] sm:$0xff] }
 0x334   :  { %v642_v56 = vadd.f32 %v567_v53, %v496_v44  ;;  %v644_v61 = vadd.f32 %v638_v54, %v498_v60 }
 0x335   :  { %v1707_v57 = vmul.f32 -1.442695, %v641_v51 }
 0x336   :  { %v1708_v59 = vmul.f32 -1.442695, %v642_v56  ;;  %v1709_v2 = vmul.f32 -1.442695, %v644_v61  ;;  %v679_v61 = vld [vmem:[#allocation4 + $0x70] sm:$0xff] }
 0x337   :  { %2357 = vpow2.f32 %v1707_v57 }
 0x338   :  { %2359 = vpow2.f32 %v1708_v59  ;;  %v680_v59 = vld [vmem:[#allocation4 + $0x78] sm:$0xff] }
 0x339   :  { %2361 = vpow2.f32 %v1709_v2 }
 0x33a   :  { %2363 = vtanh.f32 %v643_v3 }
 0x341   :  { %v2358_v5 = vpop.eup %2357 }
 0x342   :  { %v2360_v6 = vpop.eup %2359  ;;  %v648_v11 = vadd.f32 1.0, %v2358_v5 }
 0x343   :  { %v654_v12 = vadd.f32 1.0, %v2360_v6  ;;  %v2362_v13 = vpop.eup %2361 }
 0x344   :  { %2365 = vrcp.f32 %v648_v11  ;;  %v2364_v16 = vpop.eup %2363  ;;  %v661_v23 = vadd.f32 1.0, %v2362_v13 }
 0x345   :  { %2367 = vrcp.f32 %v654_v12 }
 0x346   :  { %2369 = vrcp.f32 %v661_v23 }
 0x34e   :  { %v2366_v19 = vpop.eup %2365 }
 0x34f   :  { %v2368_v20 = vpop.eup %2367  ;;  %v665_v21 = vmul.f32 %v2366_v19, %v2364_v16 }
 0x350   :  { %v664_v28 = vmul.f32 %v2368_v20, %v2800_v34  ;;  %v2370_v36 = vpop.eup %2369  ;;  %v677_v34 = vld [vmem:[#allocation4 + $0x60] sm:$0xff] }
 0x352   :  { %v2838_v29 = vadd.f32 %v665_v21, %v664_v28 }
 0x354   :  { %2371 = vtanh.f32 %v2838_v29 }
 0x35e   :  { %v2372_v38 = vpop.eup %2371 }
 0x35f   :  { %v668_v43 = vmul.f32 %v2372_v38, %v2370_v36 }
 0x361   :  { %746 = vmatmul.mubr.f32.vlgmr.msra.gmra.mrb[6].mxu0 %v668_v43  ;;  %817 = vmatmul.mubr.f32.vlgmr.msra.gmra.mrb[6].mxu1 %v668_v43 }
 0x362   :  { %2037 = vmatpush1.bf16.msra.mxu0 %v2630_v8  ;;  %2069 = vmatpush1.bf16.msra.mxu1 %v2643_v25 }
 0x363   :  { %2039 = vmatprep.subr.bf16.mxu0 %v2632_v9  ;;  %2071 = vmatprep.subr.bf16.mxu1 %v2653_v33 }
 0x364   :  { %927 = vmatprep.mubr.f32.mxu0 %v2554_v0  ;;  %998 = vmatprep.mubr.f32.mxu1 %v2554_v0 }
 0x366   :  { %2041 = vmatpush1.bf16.msra.mxu0 %v2636_v14  ;;  %2073 = vmatpush1.bf16.msra.mxu1 %v2655_v37 }
 0x367   :  { %2043 = vmatprep.subr.bf16.mxu0 %v2639_v17  ;;  %2075 = vmatprep.subr.bf16.mxu1 %v2661_v45 }
 0x36a   :  { %2045 = vmatpush1.bf16.msra.mxu0 %v2646_v26  ;;  %2077 = vmatpush1.bf16.msra.mxu1 %v2667_v48 }
 0x36b   :  { %2047 = vmatprep.subr.bf16.mxu0 %v2650_v30  ;;  %2079 = vmatprep.subr.bf16.mxu1 %v2670_v52 }
 0x36e   :  { %2049 = vmatpush1.bf16.msra.mxu0 %v2659_v42  ;;  %2081 = vmatpush1.bf16.msra.mxu1 %v2679_v62 }
 0x36f   :  { %2051 = vmatprep.subr.bf16.mxu0 %v2664_v46  ;;  %2083 = vmatprep.subr.bf16.mxu1 %v2682_v1 }
 0x372   :  { %2053 = vmatpush1.bf16.msra.mxu0 %v2673_v55  ;;  %2085 = vmatpush1.bf16.msra.mxu1 %v2691_v15 }
 0x373   :  { %2055 = vmatprep.subr.bf16.mxu0 %v2676_v58  ;;  %2087 = vmatprep.subr.bf16.mxu1 %v2694_v18 }
 0x376   :  { %2057 = vmatpush1.bf16.msra.mxu0 %v2685_v7  ;;  %2089 = vmatpush1.bf16.msra.mxu1 %v2703_v31 }
 0x377   :  { %2059 = vmatprep.subr.bf16.mxu0 %v2688_v10  ;;  %2091 = vmatprep.subr.bf16.mxu1 %v2706_v32 }
 0x37a   :  { %2061 = vmatpush1.bf16.msra.mxu0 %v2697_v24  ;;  %2093 = vmatpush1.bf16.msra.mxu1 %v2713_v40 }
 0x37b   :  { %2063 = vmatprep.subr.bf16.mxu0 %v2700_v27  ;;  %2095 = vmatprep.subr.bf16.mxu1 %v2716_v41 }
 0x37e   :  { %2065 = vmatpush1.bf16.msra.mxu0 %v2709_v39  ;;  %2097 = vmatpush1.bf16.msra.mxu1 %v2720_v47 }
 0x37f   :  { %2099 = vmatprep.subr.bf16.mxu0 %v2628_v4  ;;  %2131 = vmatprep.subr.bf16.mxu1 %v2641_v22 }
 0x434   :  { %v747_v44 = vpop.f32.mrb[6].mxu0  ;;  %v818_v49 = vpop.f32.mrb[6].mxu1 }
 0x435   :  { %v823_v50 = vadd.f32 %v747_v44, %v677_v34  ;;  %v749_v51 = vpop.f32.mrb[7].mxu0  ;;  %v820_v53 = vpop.f32.mrb[7].mxu1  ;;  %v825_v2 = vadd.f32 %v818_v49, %v679_v61  ;;  %v860_v34 = vld [vmem:[#allocation4 + $0x88] sm:$0xff] }
 0x436   :  { %v824_v54 = vadd.f32 %v749_v51, %v678_v35  ;;  %v826_v60 = vadd.f32 %v820_v53, %v680_v59 }
 0x437   :  { %v1710_v56 = vmul.f32 -1.442695, %v823_v50 }
 0x438   :  { %v1711_v57 = vmul.f32 -1.442695, %v824_v54  ;;  %v1712_v63 = vmul.f32 -1.442695, %v826_v60  ;;  %v861_v60 = vld [vmem:[#allocation4 + $0x90] sm:$0xff] }
 0x439   :  { %2373 = vpow2.f32 %v1710_v56 }
 0x43a   :  { %2375 = vpow2.f32 %v1711_v57  ;;  %v862_v57 = vld [vmem:[#allocation4 + $0x98] sm:$0xff] }
 0x43b   :  { %2377 = vpow2.f32 %v1712_v63 }
 0x43c   :  { %2379 = vtanh.f32 %v825_v2 }
 0x443   :  { %v2374_v3 = vpop.eup %2373 }
 0x444   :  { %v2376_v5 = vpop.eup %2375  ;;  %v830_v6 = vadd.f32 1.0, %v2374_v3 }
 0x445   :  { %v836_v11 = vadd.f32 1.0, %v2376_v5  ;;  %v2378_v12 = vpop.eup %2377 }
 0x446   :  { %2381 = vrcp.f32 %v830_v6  ;;  %v2380_v13 = vpop.eup %2379  ;;  %v843_v21 = vadd.f32 1.0, %v2378_v12 }
 0x447   :  { %2383 = vrcp.f32 %v836_v11 }
 0x448   :  { %2385 = vrcp.f32 %v843_v21 }
 0x450   :  { %v2382_v16 = vpop.eup %2381 }
 0x451   :  { %v2384_v19 = vpop.eup %2383  ;;  %v847_v20 = vmul.f32 %v2382_v16, %v2380_v13 }
 0x452   :  { %v846_v23 = vmul.f32 %v2384_v19, %v2838_v29  ;;  %v2386_v36 = vpop.eup %2385  ;;  %v859_v29 = vld [vmem:[#allocation4 + $0x80] sm:$0xff] }
 0x454   :  { %v2876_v28 = vadd.f32 %v847_v20, %v846_v23 }
 0x456   :  { %2387 = vtanh.f32 %v2876_v28 }
 0x460   :  { %v2388_v38 = vpop.eup %2387 }
 0x461   :  { %v850_v43 = vmul.f32 %v2388_v38, %v2386_v36 }
 0x463   :  { %928 = vmatmul.mubr.f32.vlgmr.msra.gmra.mrb[8].mxu0 %v850_v43  ;;  %999 = vmatmul.mubr.f32.vlgmr.msra.gmra.mrb[8].mxu1 %v850_v43 }
 0x464   :  { %2101 = vmatpush1.bf16.msra.mxu0 %v2630_v8  ;;  %2133 = vmatpush1.bf16.msra.mxu1 %v2643_v25 }
 0x465   :  { %2103 = vmatprep.subr.bf16.mxu0 %v2632_v9  ;;  %2135 = vmatprep.subr.bf16.mxu1 %v2653_v33 }
 0x466   :  { %1109 = vmatprep.mubr.f32.mxu0 %v2554_v0  ;;  %1180 = vmatprep.mubr.f32.mxu1 %v2554_v0 }
 0x468   :  { %2105 = vmatpush1.bf16.msra.mxu0 %v2636_v14  ;;  %2137 = vmatpush1.bf16.msra.mxu1 %v2655_v37 }
 0x469   :  { %2107 = vmatprep.subr.bf16.mxu0 %v2639_v17  ;;  %2139 = vmatprep.subr.bf16.mxu1 %v2661_v45 }
 0x46c   :  { %2109 = vmatpush1.bf16.msra.mxu0 %v2646_v26  ;;  %2141 = vmatpush1.bf16.msra.mxu1 %v2667_v48 }
 0x46d   :  { %2111 = vmatprep.subr.bf16.mxu0 %v2650_v30  ;;  %2143 = vmatprep.subr.bf16.mxu1 %v2670_v52 }
 0x470   :  { %2113 = vmatpush1.bf16.msra.mxu0 %v2659_v42  ;;  %2145 = vmatpush1.bf16.msra.mxu1 %v2679_v62 }
 0x471   :  { %2115 = vmatprep.subr.bf16.mxu0 %v2664_v46  ;;  %2147 = vmatprep.subr.bf16.mxu1 %v2682_v1 }
 0x474   :  { %2117 = vmatpush1.bf16.msra.mxu0 %v2673_v55  ;;  %2149 = vmatpush1.bf16.msra.mxu1 %v2691_v15 }
 0x475   :  { %2119 = vmatprep.subr.bf16.mxu0 %v2676_v58  ;;  %2151 = vmatprep.subr.bf16.mxu1 %v2694_v18 }
 0x478   :  { %2121 = vmatpush1.bf16.msra.mxu0 %v2685_v7  ;;  %2153 = vmatpush1.bf16.msra.mxu1 %v2703_v31 }
 0x479   :  { %2123 = vmatprep.subr.bf16.mxu0 %v2688_v10  ;;  %2155 = vmatprep.subr.bf16.mxu1 %v2706_v32 }
 0x47c   :  { %2125 = vmatpush1.bf16.msra.mxu0 %v2697_v24  ;;  %2157 = vmatpush1.bf16.msra.mxu1 %v2713_v40 }
 0x47d   :  { %2127 = vmatprep.subr.bf16.mxu0 %v2700_v27  ;;  %2159 = vmatprep.subr.bf16.mxu1 %v2716_v41 }
 0x480   :  { %2129 = vmatpush1.bf16.msra.mxu0 %v2709_v39  ;;  %2161 = vmatpush1.bf16.msra.mxu1 %v2720_v47 }
 0x481   :  { %2163 = vmatprep.subr.bf16.mxu0 %v2628_v4  ;;  %2195 = vmatprep.subr.bf16.mxu1 %v2641_v22 }
 0x536   :  { %v929_v35 = vpop.f32.mrb[8].mxu0  ;;  %v1000_v44 = vpop.f32.mrb[8].mxu1 }
 0x537   :  { %v1005_v49 = vadd.f32 %v929_v35, %v859_v29  ;;  %v931_v50 = vpop.f32.mrb[9].mxu0  ;;  %v1002_v51 = vpop.f32.mrb[9].mxu1  ;;  %v1007_v63 = vadd.f32 %v1000_v44, %v861_v60  ;;  %v1042_v29 = vld [vmem:[#allocation4 + $0xa8] sm:$0xff] }
 0x538   :  { %v1006_v53 = vadd.f32 %v931_v50, %v860_v34  ;;  %v1008_v59 = vadd.f32 %v1002_v51, %v862_v57 }
 0x539   :  { %v1713_v54 = vmul.f32 -1.442695, %v1005_v49 }
 0x53a   :  { %v1714_v56 = vmul.f32 -1.442695, %v1006_v53  ;;  %v1715_v61 = vmul.f32 -1.442695, %v1008_v59  ;;  %v1043_v59 = vld [vmem:[#allocation4 + $0xb0] sm:$0xff] }
 0x53b   :  { %2389 = vpow2.f32 %v1713_v54 }
 0x53c   :  { %2391 = vpow2.f32 %v1714_v56  ;;  %v1044_v56 = vld [vmem:[#allocation4 + $0xb8] sm:$0xff] }
 0x53d   :  { %2393 = vpow2.f32 %v1715_v61 }
 0x53e   :  { %2395 = vtanh.f32 %v1007_v63 }
 0x545   :  { %v2390_v2 = vpop.eup %2389 }
 0x546   :  { %v2392_v3 = vpop.eup %2391  ;;  %v1012_v5 = vadd.f32 1.0, %v2390_v2 }
 0x547   :  { %v1018_v6 = vadd.f32 1.0, %v2392_v3  ;;  %v2394_v11 = vpop.eup %2393 }
 0x548   :  { %2397 = vrcp.f32 %v1012_v5  ;;  %v2396_v12 = vpop.eup %2395  ;;  %v1025_v20 = vadd.f32 1.0, %v2394_v11 }
 0x549   :  { %2399 = vrcp.f32 %v1018_v6 }
 0x54a   :  { %2401 = vrcp.f32 %v1025_v20 }
 0x552   :  { %v2398_v13 = vpop.eup %2397 }
 0x553   :  { %v2400_v16 = vpop.eup %2399  ;;  %v1029_v19 = vmul.f32 %v2398_v13, %v2396_v12 }
 0x554   :  { %v1028_v21 = vmul.f32 %v2400_v16, %v2876_v28  ;;  %v2402_v36 = vpop.eup %2401  ;;  %v1041_v28 = vld [vmem:[#allocation4 + $0xa0] sm:$0xff] }
 0x556   :  { %v2914_v23 = vadd.f32 %v1029_v19, %v1028_v21 }
 0x558   :  { %2403 = vtanh.f32 %v2914_v23 }
 0x562   :  { %v2404_v38 = vpop.eup %2403 }
 0x563   :  { %v1032_v43 = vmul.f32 %v2404_v38, %v2402_v36  ;;  %v1592_v38 = vld [vmem:[#allocation9 + $0x8] sm:$0xff] }
 0x565   :  { %1110 = vmatmul.mubr.f32.vlgmr.msra.gmra.mrb[10].mxu0 %v1032_v43  ;;  %1181 = vmatmul.mubr.f32.vlgmr.msra.gmra.mrb[10].mxu1 %v1032_v43 }
 0x566   :  { %2165 = vmatpush1.bf16.msra.mxu0 %v2630_v8  ;;  %2197 = vmatpush1.bf16.msra.mxu1 %v2643_v25 }
 0x567   :  { %2167 = vmatprep.subr.bf16.mxu0 %v2632_v9  ;;  %2199 = vmatprep.subr.bf16.mxu1 %v2653_v33 }
 0x568   :  { %1291 = vmatprep.mubr.f32.mxu0 %v2554_v0  ;;  %1362 = vmatprep.mubr.f32.mxu1 %v2554_v0 }
 0x56a   :  { %2169 = vmatpush1.bf16.msra.mxu0 %v2636_v14  ;;  %2201 = vmatpush1.bf16.msra.mxu1 %v2655_v37 }
 0x56b   :  { %2171 = vmatprep.subr.bf16.mxu0 %v2639_v17  ;;  %2203 = vmatprep.subr.bf16.mxu1 %v2661_v45 }
 0x56e   :  { %2173 = vmatpush1.bf16.msra.mxu0 %v2646_v26  ;;  %2205 = vmatpush1.bf16.msra.mxu1 %v2667_v48 }
 0x56f   :  { %2175 = vmatprep.subr.bf16.mxu0 %v2650_v30  ;;  %2207 = vmatprep.subr.bf16.mxu1 %v2670_v52 }
 0x572   :  { %2177 = vmatpush1.bf16.msra.mxu0 %v2659_v42  ;;  %2209 = vmatpush1.bf16.msra.mxu1 %v2679_v62 }
 0x573   :  { %2179 = vmatprep.subr.bf16.mxu0 %v2664_v46  ;;  %2211 = vmatprep.subr.bf16.mxu1 %v2682_v1 }
 0x576   :  { %2181 = vmatpush1.bf16.msra.mxu0 %v2673_v55  ;;  %2213 = vmatpush1.bf16.msra.mxu1 %v2691_v15 }
 0x577   :  { %2183 = vmatprep.subr.bf16.mxu0 %v2676_v58  ;;  %2215 = vmatprep.subr.bf16.mxu1 %v2694_v18 }
 0x57a   :  { %2185 = vmatpush1.bf16.msra.mxu0 %v2685_v7  ;;  %2217 = vmatpush1.bf16.msra.mxu1 %v2703_v31 }
 0x57b   :  { %2187 = vmatprep.subr.bf16.mxu0 %v2688_v10  ;;  %2219 = vmatprep.subr.bf16.mxu1 %v2706_v32 }
 0x57e   :  { %2189 = vmatpush1.bf16.msra.mxu0 %v2697_v24  ;;  %2221 = vmatpush1.bf16.msra.mxu1 %v2713_v40 }
 0x57f   :  { %2191 = vmatprep.subr.bf16.mxu0 %v2700_v27  ;;  %2223 = vmatprep.subr.bf16.mxu1 %v2716_v41 }
 0x582   :  { %2193 = vmatpush1.bf16.msra.mxu0 %v2709_v39  ;;  %2225 = vmatpush1.bf16.msra.mxu1 %v2720_v47 }
 0x583   :  { %2227 = vmatprep.subr.bf16.mxu0 %v2628_v4  ;;  %2259 = vmatprep.subr.bf16.mxu1 %v2641_v22 }
 0x638   :  { %v1111_v34 = vpop.f32.mrb[10].mxu0  ;;  %v1182_v35 = vpop.f32.mrb[10].mxu1 }
 0x639   :  { %v1187_v44 = vadd.f32 %v1111_v34, %v1041_v28  ;;  %v1113_v49 = vpop.f32.mrb[11].mxu0  ;;  %v1184_v50 = vpop.f32.mrb[11].mxu1  ;;  %v1189_v61 = vadd.f32 %v1182_v35, %v1043_v59  ;;  %v2555_v28 = vmov 0.0|0.0   ;;  %v1594_v34 = vld [vmem:[#allocation9 + $0x18] sm:$0xff] }
 0x63a   :  { %v1188_v51 = vadd.f32 %v1113_v49, %v1042_v29  ;;  %v1190_v57 = vadd.f32 %v1184_v50, %v1044_v56  ;;  %v1593_v29 = vld [vmem:[#allocation9 + $0x10] sm:$0xff]  ;;  %v1596_v49 = vld [vmem:[#allocation9 + $0x28] sm:$0xff]  ;;  %v1599_v56 = vld [vmem:[#allocation9 + $0x40] sm:$0xff] }
 0x63b   :  { %v1716_v53 = vmul.f32 -1.442695, %v1187_v44  ;;  %v2294_v35 = vpack.c.bf16 %v1594_v34, %v1593_v29  ;;  %v1595_v44 = vld [vmem:[#allocation9 + $0x20] sm:$0xff] }
 0x63c   :  { %v1717_v54 = vmul.f32 -1.442695, %v1188_v51  ;;  %v1718_v60 = vmul.f32 -1.442695, %v1190_v57  ;;  %v2297_v50 = vpack.c.bf16 %v1596_v49, %v1595_v44  ;;  %v1597_v51 = vld [vmem:[#allocation9 + $0x30] sm:$0xff]  ;;  %v1600_v57 = vld [vmem:[#allocation9 + $0x48] sm:$0xff] }
 0x63d   :  { %2405 = vpow2.f32 %v1716_v53  ;;  %v1598_v53 = vld [vmem:[#allocation9 + $0x38] sm:$0xff]  ;;  %v2303_v59 = vpack.c.bf16 %v1600_v57, %v1599_v56 }
 0x63e   :  { %2407 = vpow2.f32 %v1717_v54  ;;  %v2300_v54 = vpack.c.bf16 %v1598_v53, %v1597_v51 }
 0x63f   :  { %2409 = vpow2.f32 %v1718_v60  ;;  %v1601_v60 = vld [vmem:[#allocation9 + $0x50] sm:$0xff] }
 0x640   :  { %2411 = vtanh.f32 %v1189_v61  ;;  %v1602_v61 = vld [vmem:[#allocation9 + $0x58] sm:$0xff] }
 0x647   :  { %v2406_v4 = vpop.eup %2405 }
 0x648   :  { %v2408_v63 = vpop.eup %2407  ;;  %v1194_v22 = vadd.f32 1.0, %v2406_v4  ;;  %v1603_v4 = vld [vmem:[#allocation9 + $0x60] sm:$0xff] }
 0x649   :  { %v1200_v2 = vadd.f32 1.0, %v2408_v63  ;;  %v2410_v3 = vpop.eup %2409  ;;  %v2306_v63 = vpack.c.bf16 %v1602_v61, %v1601_v60 }
 0x64a   :  { %2413 = vrcp.f32 %v1194_v22  ;;  %v2412_v5 = vpop.eup %2411  ;;  %v1207_v13 = vadd.f32 1.0, %v2410_v3  ;;  %v1604_v22 = vld [vmem:[#allocation9 + $0x68] sm:$0xff]  ;;  %v1605_v3 = vld [vmem:[#allocation9 + $0x70] sm:$0xff] }
 0x64b   :  { %2415 = vrcp.f32 %v1200_v2  ;;  %v2309_v2 = vpack.c.bf16 %v1604_v22, %v1603_v4 }
 0x64c   :  { %2417 = vrcp.f32 %v1207_v13 }
 0x654   :  { %v2414_v6 = vpop.eup %2413 }
 0x655   :  { %v2416_v11 = vpop.eup %2415  ;;  %v1211_v12 = vmul.f32 %v2414_v6, %v2412_v5  ;;  %v1606_v5 = vld [vmem:[#allocation9 + $0x78] sm:$0xff] }
 0x656   :  { %v1210_v16 = vmul.f32 %v2416_v11, %v2914_v23  ;;  %v2418_v20 = vpop.eup %2417  ;;  %v1591_v23 = vld [vmem:[#allocation9] sm:$0xff]  ;;  %v2312_v6 = vpack.c.bf16 %v1606_v5, %v1605_v3 }
 0x657   :  { %v2291_v43 = vpack.c.bf16 %v1592_v38, %v1591_v23  ;;  %v1405_v11 = vld [vmem:[#allocation4 + $0xe0] sm:$0xff] }
 0x658   :  { %v2952_v19 = vadd.f32 %v1211_v12, %v1210_v16  ;;  %v1406_v12 = vld [vmem:[#allocation4 + $0xe8] sm:$0xff] }
 0x65a   :  { %2419 = vtanh.f32 %v2952_v19 }
 0x664   :  { %v2420_v21 = vpop.eup %2419 }
 0x665   :  { %v1214_v36 = vmul.f32 %v2420_v21, %v2418_v20 }
 0x667   :  { %1292 = vmatmul.mubr.f32.vlgmr.msra.gmra.mrb[12].mxu0 %v1214_v36  ;;  %1363 = vmatmul.mubr.f32.vlgmr.msra.gmra.mrb[12].mxu1 %v1214_v36 }
 0x668   :  { %2229 = vmatpush1.bf16.msra.mxu0 %v2630_v8  ;;  %2261 = vmatpush1.bf16.msra.mxu1 %v2643_v25  ;;  %v1223_v8 = vld [vmem:[#allocation4 + $0xc0] sm:$0xff] }
 0x669   :  { %2231 = vmatprep.subr.bf16.mxu0 %v2632_v9  ;;  %2263 = vmatprep.subr.bf16.mxu1 %v2653_v33  ;;  %v1224_v9 = vld [vmem:[#allocation4 + $0xc8] sm:$0xff] }
 0x66a   :  { %1473 = vmatprep.mubr.f32.mxu0 %v2554_v0  ;;  %1544 = vmatprep.mubr.f32.mxu1 %v2554_v0 }
 0x66c   :  { %2233 = vmatpush1.bf16.msra.mxu0 %v2636_v14  ;;  %2265 = vmatpush1.bf16.msra.mxu1 %v2655_v37 }
 0x66d   :  { %2235 = vmatprep.subr.bf16.mxu0 %v2639_v17  ;;  %2267 = vmatprep.subr.bf16.mxu1 %v2661_v45  ;;  %v1226_v45 = vld [vmem:[#allocation4 + $0xd8] sm:$0xff] }
 0x670   :  { %2237 = vmatpush1.bf16.msra.mxu0 %v2646_v26  ;;  %2269 = vmatpush1.bf16.msra.mxu1 %v2667_v48  ;;  %v1225_v48 = vld [vmem:[#allocation4 + $0xd0] sm:$0xff] }
 0x671   :  { %2239 = vmatprep.subr.bf16.mxu0 %v2650_v30  ;;  %2271 = vmatprep.subr.bf16.mxu1 %v2670_v52 }
 0x674   :  { %2241 = vmatpush1.bf16.msra.mxu0 %v2659_v42  ;;  %2273 = vmatpush1.bf16.msra.mxu1 %v2679_v62 }
 0x675   :  { %2243 = vmatprep.subr.bf16.mxu0 %v2664_v46  ;;  %2275 = vmatprep.subr.bf16.mxu1 %v2682_v1 }
 0x678   :  { %2245 = vmatpush1.bf16.msra.mxu0 %v2673_v55  ;;  %2277 = vmatpush1.bf16.msra.mxu1 %v2691_v15 }
 0x679   :  { %2247 = vmatprep.subr.bf16.mxu0 %v2676_v58  ;;  %2279 = vmatprep.subr.bf16.mxu1 %v2694_v18 }
 0x67c   :  { %2249 = vmatpush1.bf16.msra.mxu0 %v2685_v7  ;;  %2281 = vmatpush1.bf16.msra.mxu1 %v2703_v31 }
 0x67d   :  { %2251 = vmatprep.subr.bf16.mxu0 %v2688_v10  ;;  %2283 = vmatprep.subr.bf16.mxu1 %v2706_v32 }
 0x680   :  { %2253 = vmatpush1.bf16.msra.mxu0 %v2697_v24  ;;  %2285 = vmatpush1.bf16.msra.mxu1 %v2713_v40 }
 0x681   :  { %2255 = vmatprep.subr.bf16.mxu0 %v2700_v27  ;;  %2287 = vmatprep.subr.bf16.mxu1 %v2716_v41 }
 0x684   :  { %2257 = vmatpush1.bf16.msra.mxu0 %v2709_v39  ;;  %2289 = vmatpush1.bf16.msra.mxu1 %v2720_v47 }
 0x685   :  { %2290 = vmatprep.subr.bf16.mxu0 %v2555_v28 }
 0x73a   :  { %v1293_v14 = vpop.f32.mrb[12].mxu0  ;;  %v1364_v17 = vpop.f32.mrb[12].mxu1 }
 0x73b   :  { %v1369_v25 = vadd.f32 %v1293_v14, %v1223_v8  ;;  %v1295_v26 = vpop.f32.mrb[13].mxu0  ;;  %v1366_v30 = vpop.f32.mrb[13].mxu1  ;;  %v1371_v55 = vadd.f32 %v1364_v17, %v1225_v48  ;;  %v1407_v17 = vld [vmem:[#allocation4 + $0xf0] sm:$0xff] }
 0x73c   :  { %v1370_v33 = vadd.f32 %v1295_v26, %v1224_v9  ;;  %v1372_v46 = vadd.f32 %v1366_v30, %v1226_v45 }
 0x73d   :  { %v1719_v37 = vmul.f32 -1.442695, %v1369_v25 }
 0x73e   :  { %v1720_v42 = vmul.f32 -1.442695, %v1370_v33  ;;  %v1721_v52 = vmul.f32 -1.442695, %v1372_v46 }
 0x73f   :  { %2421 = vpow2.f32 %v1719_v37 }
 0x740   :  { %2423 = vpow2.f32 %v1720_v42 }
 0x741   :  { %2425 = vpow2.f32 %v1721_v52 }
 0x742   :  { %2427 = vtanh.f32 %v1371_v55 }
 0x749   :  { %v2422_v58 = vpop.eup %2421 }
 0x74a   :  { %v2424_v62 = vpop.eup %2423  ;;  %v1376_v1 = vadd.f32 1.0, %v2422_v58 }
 0x74b   :  { %v1382_v7 = vadd.f32 1.0, %v2424_v62  ;;  %v2426_v10 = vpop.eup %2425 }
 0x74c   :  { %2429 = vrcp.f32 %v1376_v1  ;;  %v2428_v15 = vpop.eup %2427  ;;  %v1389_v31 = vadd.f32 1.0, %v2426_v10 }
 0x74d   :  { %2431 = vrcp.f32 %v1382_v7 }
 0x74e   :  { %2433 = vrcp.f32 %v1389_v31 }
 0x756   :  { %v2430_v18 = vpop.eup %2429 }
 0x757   :  { %v2432_v24 = vpop.eup %2431  ;;  %v1393_v27 = vmul.f32 %v2430_v18, %v2428_v15  ;;  %v1725_v18 = vld [vmem:[%s3011_s3] ss:$0 sm:$0xff] }
 0x758   :  { %v1392_v32 = vmul.f32 %v2432_v24, %v2952_v19  ;;  %v2434_v40 = vpop.eup %2433 }
 0x75a   :  { %v2988_v39 = vadd.f32 %v1393_v27, %v1392_v32 }
 0x75c   :  { %2435 = vtanh.f32 %v2988_v39 }
 0x766   :  { %v2436_v41 = vpop.eup %2435 }
 0x767   :  { %v1396_v47 = vmul.f32 %v2436_v41, %v2434_v40 }
 0x769   :  { %1474 = vmatmul.mubr.f32.vlgmr.msra.gmra.mrb[14].mxu0 %v1396_v47  ;;  %1545 = vmatmul.mubr.f32.vlgmr.msra.gmra.mrb[14].mxu1 %v1396_v47 }
 0x76a   :  { %2292 = vmatpush3.bf16.msra.mxu0 %v2291_v43  ;;  %1775 = vmatprep.mubr.msk.f32.mxu0 %vm2556_vm0, %v2554_v0  ;;  %v1408_v0 = vld [vmem:[#allocation4 + $0xf8] sm:$0xff] }
 0x76b   :  { %2293 = vmatprep.subr.bf16.mxu0 %v2555_v28 }
 0x76e   :  { %2295 = vmatpush3.bf16.msra.mxu0 %v2294_v35 }
 0x76f   :  { %2296 = vmatprep.subr.bf16.mxu0 %v2555_v28 }
 0x772   :  { %2298 = vmatpush3.bf16.msra.mxu0 %v2297_v50 }
 0x773   :  { %2299 = vmatprep.subr.bf16.mxu0 %v2555_v28 }
 0x776   :  { %2301 = vmatpush3.bf16.msra.mxu0 %v2300_v54 }
 0x777   :  { %2302 = vmatprep.subr.bf16.mxu0 %v2555_v28 }
 0x77a   :  { %2304 = vmatpush3.bf16.msra.mxu0 %v2303_v59 }
 0x77b   :  { %2305 = vmatprep.subr.bf16.mxu0 %v2555_v28 }
 0x77e   :  { %2307 = vmatpush3.bf16.msra.mxu0 %v2306_v63 }
 0x77f   :  { %2308 = vmatprep.subr.bf16.mxu0 %v2555_v28 }
 0x782   :  { %2310 = vmatpush3.bf16.msra.mxu0 %v2309_v2 }
 0x783   :  { %2311 = vmatprep.subr.bf16.mxu0 %v2555_v28 }
 0x786   :  { %2313 = vmatpush3.bf16.msra.mxu0 %v2312_v6 }
 0x83c   :  { %v1475_v13 = vpop.f32.mrb[14].mxu0  ;;  %v1546_v16 = vpop.f32.mrb[14].mxu1 }
 0x83d   :  { %v1551_v19 = vadd.f32 %v1475_v13, %v1405_v11  ;;  %v1477_v20 = vpop.f32.mrb[15].mxu0  ;;  %v1548_v21 = vpop.f32.mrb[15].mxu1  ;;  %v1553_v26 = vadd.f32 %v1546_v16, %v1407_v17 }
 0x83e   :  { %v1552_v36 = vadd.f32 %v1477_v20, %v1406_v12  ;;  %v1554_v14 = vadd.f32 %v1548_v21, %v1408_v0 }
 0x83f   :  { %v1722_v8 = vmul.f32 -1.442695, %v1551_v19 }
 0x840   :  { %v1723_v9 = vmul.f32 -1.442695, %v1552_v36  ;;  %v1724_v25 = vmul.f32 -1.442695, %v1554_v14 }
 0x841   :  { %2437 = vpow2.f32 %v1722_v8 }
 0x842   :  { %2439 = vpow2.f32 %v1723_v9 }
 0x843   :  { %2441 = vpow2.f32 %v1724_v25 }
 0x844   :  { %2443 = vtanh.f32 %v1553_v26 }
 0x84b   :  { %v2438_v30 = vpop.eup %2437 }
 0x84c   :  { %v2440_v33 = vpop.eup %2439  ;;  %v1558_v37 = vadd.f32 1.0, %v2438_v30 }
 0x84d   :  { %v1564_v42 = vadd.f32 1.0, %v2440_v33  ;;  %v2442_v45 = vpop.eup %2441 }
 0x84e   :  { %2445 = vrcp.f32 %v1558_v37  ;;  %v2444_v46 = vpop.eup %2443  ;;  %v1571_v58 = vadd.f32 1.0, %v2442_v45 }
 0x84f   :  { %2447 = vrcp.f32 %v1564_v42 }
 0x850   :  { %2449 = vrcp.f32 %v1571_v58 }
 0x858   :  { %v2446_v48 = vpop.eup %2445 }
 0x859   :  { %v2448_v52 = vpop.eup %2447  ;;  %v1575_v55 = vmul.f32 %v2446_v48, %v2444_v46 }
 0x85a   :  { %v1574_v62 = vmul.f32 %v2448_v52, %v2988_v39  ;;  %v2450_v7 = vpop.eup %2449 }
 0x85c   :  { %v1576_v1 = vadd.f32 %v1575_v55, %v1574_v62 }
 0x85e   :  { %2451 = vtanh.f32 %v1576_v1 }
 0x868   :  { %v2452_v10 = vpop.eup %2451 }
 0x869   :  { %v1578_v15 = vmul.f32 %v2452_v10, %v2450_v7 }
 0x86b   :  { %1776 = vmatmul.mubr.f32.vlgmr.msra.gmra.mrb[16].mxu0 %v1578_v15 }
 0x93e   :  { %v1680_v24 = vpop.f32.mrb[16].mxu0 }
 0x93f   :  { %v1681_v27 = vadd.f32 %v1725_v18, %v1680_v24  ;;  %v1777_v31 = vpop.f32.mrb[17].mxu0 }
 0x941   :  { %1684 = vst [vmem:[#allocation10] sm:$0xff] %v1681_v27 }
 0x942   :  { %2530 = shalt.err (!%p2527_p0)
}
 0x943   :  { %s2531_s7 = scalar_lea.hbm %s3012_s4, 128 }
 0x944   :  { %p2532_p1 = scmp.ne.s32.totalorder %s3012_s4, %s2531_s7  ;;  %p2535_p2 = scmp.lt.u32.totalorder %s2531_s7, %s3012_s4 }
 0x946   :  { %p2537_p3 = pnand %p2535_p2, %p2532_p1 }
 0x948   :  { %2540 = shalt.err (!%p2537_p3)
}
 0x949   :  { %1694 = dma.vmem_to_hbm [thread:$0]  %s1692_s29, 128, %s3012_s4, [#allocation6]  }
 0x94a   :  { %2545 = dma.done.wait [#allocation6], 128  }
 0x94b   :  { %2546 = vsyncadd [#allocation6], 4294967168 }
 0x94c   :  { %1698 = vsyncpa [#allocation5], 1 }
 0x94d   :  { %1699 = vsyncpa [#allocation8], 1 }
 0x94e   :  { %1700 = vsyncpa [#allocation6], 1 }

</bundles_post_ra>
